<compile_context>
chip_gen: v7x
topology: tpu7x:2x2x1
jax: 0.10.0
libtpu: 0.0.40
codegen_flags: <defaults>
</compile_context>

<pallas_src>
import functools

import jax
import jax.numpy as jnp
from jax.experimental import pallas as pl
from jax.experimental.pallas import tpu as pltpu


# ----------------------------------------------------------------------------
# Kernel
# ----------------------------------------------------------------------------
def _h_sigmoid_kernel(x_ref, o_ref, *, h_max):
    # x_ref / o_ref: (block_rows, lane_width) tiles, lane-dense (lane % 128 == 0).
    x = x_ref[...]
    if not jnp.issubdtype(x.dtype, jnp.floating):
        x = x.astype(jnp.float32)
    # Weak-typed python scalars keep the math in the input's own float dtype
    # (bf16 stays bf16 on v6e/v7x; f32 stays f32).
    y = jnp.clip(x + 3.0, 0.0, 6.0) * (h_max / 6.0)
    o_ref[...] = y.astype(o_ref.dtype)


def _h_sigmoid_jnp(x, h_max):
    # Fused single-pass XLA fallback (small or lane-unaligned inputs).
    return jnp.clip(x + 3.0, 0.0, 6.0) * (h_max / 6.0)


# ----------------------------------------------------------------------------
# Wrapper
# ----------------------------------------------------------------------------
def h_sigmoid(x, h_max=1.0, *, min_pallas_elems=64 * 1024,
              target_block_bytes=2 << 20):
    """Element-wise ReLU6(x + 3) * h_max / 6 for any input shape."""
    h_max = float(h_max)
    n = x.size

    # Fast path 1: tiny tensors -> let XLA fuse; Pallas launch overhead would
    # dominate and fusion removes an HBM round-trip.
    if n < min_pallas_elems:
        return _h_sigmoid_jnp(x, h_max)

    # Fast path 2: lane-unaligned sizes (n % 128 != 0).  A fused jnp pass is
    # exactly 2*n bytes of HBM traffic; any pad/slice or prefix+concat scheme
    # around Pallas costs 4-6x n.  Keep Pallas for the aligned common case.
    if n % 128 != 0:
        return _h_sigmoid_jnp(x, h_max)

    orig_shape = x.shape
    dtype = x.dtype
    itemsize = jnp.dtype(dtype).itemsize

    # Largest lane-dense width that divides n exactly -> zero-copy reshape.
    lane_width = 128
    for cand in (1024, 512, 256):
        if n % cand == 0:
            lane_width = cand
            break
    rows = n // lane_width

    # Byte-based block sizing: ~target_block_bytes per buffer (so bf16 tiles
    # carry 2x the elements of f32 tiles), rows a multiple of 8.
    block_rows = max(8, (target_block_bytes // (lane_width * itemsize)) // 8 * 8)
    # Cap so the parallel grid has >= 2 steps -> both v7x TensorCores get work.
    if rows > 8:
        two_block_cap = ((pl.cdiv(rows, 2) + 7) // 8) * 8
        block_rows = max(8, min(block_rows, two_block_cap))
    n_blocks = pl.cdiv(rows, block_rows)

    # Metadata-only reshapes (x is contiguous): no extra HBM traffic.
    x2 = x.reshape(rows, lane_width)

    cost = pl.CostEstimate(
        flops=4 * n,                      # add + 2x cmp/select + mul per elem
        transcendentals=0,
        bytes_accessed=2 * n * itemsize,  # read x, write out
    )

    out2 = pl.pallas_call(
        functools.partial(_h_sigmoid_kernel, h_max=h_max),
        out_shape=jax.ShapeDtypeStruct((rows, lane_width), dtype),
        grid_spec=pltpu.PrefetchScalarGridSpec(
            num_scalar_prefetch=0,
            grid=(n_blocks,),
            in_specs=[pl.BlockSpec((block_rows, lane_width), lambda i: (i, 0))],
            out_specs=pl.BlockSpec((block_rows, lane_width), lambda i: (i, 0)),
        ),
        compiler_params=pltpu.CompilerParams(
            dimension_semantics=("parallel",),
        ),
        cost_estimate=cost,
        # Note: input_output_aliases={0: 0} could drop one HBM allocation when
        # the caller donates x; left off because this wrapper cannot know that.
    )(x2)

    return out2.reshape(orig_shape)


def h_sigmoid_ref(x, h_max=1.0):
    return jnp.clip(x + 3.0, 0.0, 6.0) * (h_max / 6.0)


# ----------------------------------------------------------------------------
# Demo / self-test
# ----------------------------------------------------------------------------
if __name__ == "__main__":
    key = jax.random.PRNGKey(0)
    k1, k2, k3 = jax.random.split(key, 3)
    h_max = 1.0

    # Module-consistent small activation tensor (batch=2, channels=4, 16x16):
    # takes the fused-jnp fast path (Pallas overhead would dominate).
    x_small = jax.random.normal(k1, (2, 4, 16, 16), dtype=jnp.float32) * 4.0

    # Medium aligned tensor (RGSL-style: batch=2, hidden=64, nodes=207, T=12):
    # n = 317,952 = 512 * 621 -> zero-copy Pallas path, 2 parallel grid steps.
    x_med = jax.random.normal(k2, (2, 64, 207, 12), dtype=jnp.float32) * 4.0

    # Lane-unaligned tensor (n % 128 != 0): fused-jnp fallback path.
    x_rag = jax.random.normal(k3, (3, 7, 131, 53), dtype=jnp.float32) * 4.0

    for xin in (x_small, x_med, x_rag):
        out = jax.block_until_ready(h_sigmoid(xin, h_max))
        ref = h_sigmoid_ref(xin, h_max)
        assert out.shape == xin.shape and out.dtype == xin.dtype
        assert jnp.allclose(out, ref, atol=1e-6, rtol=1e-6), "f32 mismatch"

    # bf16 stream: native bf16 compute in-kernel (no f32 round-trip).
    x_bf16 = x_med.astype(jnp.bfloat16)
    out_bf16 = jax.block_until_ready(h_sigmoid(x_bf16, h_max))
    ref_bf16 = h_sigmoid_ref(x_bf16.astype(jnp.float32), h_max)
    assert out_bf16.dtype == jnp.bfloat16
    assert jnp.allclose(out_bf16.astype(jnp.float32), ref_bf16,
                        atol=2e-2, rtol=2e-2), "bf16 mismatch"

    print("KERNEL_OK")
</pallas_src>

<mosaic_0001>
module attributes {stable_mosaic.version = 11 : i64} {
  func.func @_h_sigmoid_kernel(%arg0: i32, %arg1: memref<312x512xf32, #tpu.memory_space<vmem>>, %arg2: memref<312x512xf32, #tpu.memory_space<vmem>>) attributes {dimension_semantics = [#tpu.dimension_semantics<parallel>], iteration_bounds = array<i64: 2>, scalar_prefetch = 0 : i64, scratch_operands = 0 : i64, tpu.core_type = #tpu.core_type<tc>, window_params = [{transform_indices = @transform_0, window_bounds = array<i64: 312, 512>}, {transform_indices = @transform_1, window_bounds = array<i64: 312, 512>}]} {
    %c0 = arith.constant 0 : index
    %c0_0 = arith.constant 0 : index
    %0 = vector.load %arg1[%c0, %c0_0] : memref<312x512xf32, #tpu.memory_space<vmem>>, vector<312x512xf32>
    %cst = arith.constant 3.000000e+00 : f32
    %1 = vector.broadcast %cst : f32 to vector<312x512xf32>
    %2 = arith.addf %0, %1 : vector<312x512xf32>
    %cst_1 = arith.constant 0.000000e+00 : f32
    %cst_2 = arith.constant 6.000000e+00 : f32
    %3 = vector.broadcast %cst_1 : f32 to vector<312x512xf32>
    %4 = arith.maximumf %3, %2 : vector<312x512xf32>
    %5 = vector.broadcast %cst_2 : f32 to vector<312x512xf32>
    %6 = arith.minimumf %5, %4 : vector<312x512xf32>
    %cst_3 = arith.constant 0.166666672 : f32
    %7 = vector.broadcast %cst_3 : f32 to vector<312x512xf32>
    %8 = arith.mulf %6, %7 : vector<312x512xf32>
    %c0_4 = arith.constant 0 : index
    %c0_5 = arith.constant 0 : index
    %9 = vector.load %arg2[%c0_4, %c0_5] : memref<312x512xf32, #tpu.memory_space<vmem>>, vector<312x512xf32>
    tpu.vector_store %arg2[%c0_4, %c0_5], %8 {strides = array<i32>} : memref<312x512xf32, #tpu.memory_space<vmem>>, vector<312x512xf32>,
    return
  }
  func.func @transform_0(%arg0: i32) -> (i32, i32) {
    %c0_i32 = arith.constant 0 : i32
    %c0_i32_0 = arith.constant 0 : i32
    return %arg0, %c0_i32 : i32, i32
  }
  func.func @transform_1(%arg0: i32) -> (i32, i32) {
    %c0_i32 = arith.constant 0 : i32
    %c0_i32_0 = arith.constant 0 : i32
    return %arg0, %c0_i32 : i32, i32
  }
}

</mosaic_0001>

<bundles_post_ra>
// kernel: tpu_custom_call.1
= control target key start
LH: loop header
LB: loop body
LE: loop exit
PB: predicated region body
PF: predicated region fallthrough
CT: control target
= control target key end

     0   :  { %6 = vsyncpa [#allocation3], 0  ;;  %s1821_s0 = inlined_call_operand.hbm [shape: f32[621,512], index: 0, kind: input, shape index: {}]   ;;  %s1822_s1 = inlined_call_operand.hbm [shape: f32[621,512], index: 1, kind: output, shape index: {}]  }
   0x1   :  { %8 = vsyncpa [#allocation3 + $0x1], 0 }
   0x2   :  { %9 = vsyncpa [#allocation4], 0 }
   0x3   :  { %11 = vsyncpa [#allocation4 + $0x1], 0  ;;  %s1344_s6 = smov 0   ;;  %s1346_s7 = smov 0  }
   0x4   :  { %s1348_s8 = smov 0   ;;  %s1350_s9 = smov 0  }
   0x5 LB: > { %s1365_s10 = sadd.s32 4294967295, %s1326_s9   ;;  %s1162_s11 = sadd.s32 4294967294, %s1326_s9   ;;  %s1326_s9 = sphi %s1350_s9, %s1834_s9   ;;  %s1322_s8 = sphi %s1348_s8, %s1833_s8   ;;  %s1318_s7 = sphi %s1346_s7, %s1832_s7   ;;  %s1314_s6 = sphi %s1344_s6, %s1831_s6  }
   0x6   : > { %s1369_s12 = sadd.s32 1, %s1326_s9   ;;  %s24_s13 = sadd.s32 1, %s1322_s8 }
   0x7   : > { %s21_s14 = ssub.s32 %s1326_s9, %s1369_s12  ;;  %p31_p0 = scmp.ne.s32.totalorder %s1322_s8, %s1318_s7 }
   0x8   : > { %p22_p1 = scmp.eq.s32.totalorder %s21_s14, 0  ;;  %p32_p2 = scmp.eq.s32.totalorder %s1326_s9, 0 }
   0x9   : > { %p37_p3 = scmp.ne.s32.totalorder %s1318_s7, %s1314_s6  ;;  %p38_p4 = scmp.eq.s32.totalorder %s1365_s10, 0 }
   0xa   : > { %s1381_s15 = scalar_select %p22_p1, %s1322_s8, %s24_s13  }
   0xb   : > { %p33_p5 = por %p32_p2, %p31_p0  ;;  %p1383_p6 = por %p38_p4, %p37_p3 }
   0xc   : > { %p61_p7 = scmp.eq.s32.totalorder %s1365_s10, 1  ;;  %p67_p8 = scmp.eq.s32.totalorder %s1162_s11, 1 }
   0xd   : > { %p1192_p10 = scmp.lt.s32.totalorder %s1326_s9, 2  ;;  %s87_s19 = sand.u32 1, %s1322_s8  }
   0xe   : > { %p1390_p11 = por %p61_p7, %p31_p0  ;;  %p1394_p12 = por %p67_p8, %p37_p3 }
   0xf   : > { %s1176_s20 = smul.u32 19968, %s1326_s9  ;;  %p1405_p13 = pnand %p1192_p10, %p33_p5 }
  0x10   : > { %s1825_s17 = scalar_select %p1390_p11, 1, 0 }
  0x11   : > { %s1826_s18 = scalar_select %p1394_p12, 1, 0 }
  0x12   : > { %s1178_s21 = smul.u32 1248, %s87_s19  ;;  %s1403_s24 = scalar_lea.hbm %s1821_s0, %s1176_s20 }
  0x13   : > { %s1411_s28 = scalar_lea.sflag [#allocation3], %s87_s19  ;;  %s1230_s29 = scalar_lea.hbm %s1403_s24, 19968 }
  0x14   : > { %s91_s26 = scalar_lea.vmem [#allocation2], %s1178_s21  ;;  %p1231_p0 = scmp.ne.s32.totalorder %s1403_s24, %s1230_s29 }
  0x15   : > { %s99_s27 = sshll.u32 %s91_s26, 4  ;;  %p1232_p1 = pneg %p1405_p13  ;;  %s1409_s27 = int_to_ptr.vmem [resolvable:$true] %s99_s27 }
  0x16   : > { %s1235_s3 = scalar_lea.hbm %s1821_s0, 39936  ;;  %p1236_p4 = scmp.lt.u32.totalorder %s1403_s24, %s1821_s0 }
  0x17   : > { %p1233_p2 = pnand %p1232_p1, %p1231_p0  ;;  %p1237_p5 = scmp.lt.u32.totalorder %s1235_s3, %s1230_s29 }
  0x18   : > { %p1239_p8 = scmp.lt.u32.totalorder %s1230_s29, %s1403_s24 }
  0x19   : > { %p1234_p3 = pneg %p1233_p2  ;;  %p1238_p7 = por %p1237_p5, %p1236_p4 }
  0x1b   : > { %p1240_p10 = por %p1239_p8, %p1238_p7 }
  0x1d   : > { %p1241_p9 = pnand %p1240_p10, %p1234_p3 }
  0x1f   : > { %1244 = shalt.err (!%p1241_p9)
}
  0x20   : > { %s1245_s11 = scalar_lea.vmem %s1409_s27, 19968  ;;  %s1328_s13 = smov [#allocation2]  }
  0x21   : > { %p1246_p0 = scmp.ne.s32.totalorder %s1409_s27, %s1245_s11  ;;  %s1250_s14 = sshll.u32 %s1328_s13, 4  ;;  %s1251_s14 = int_to_ptr.vmem [resolvable:$false] %s1250_s14 }
  0x22   : > { %s1252_s19 = scalar_lea.vmem %s1251_s14, 39936  ;;  %p1253_p11 = scmp.lt.s32.totalorder %s1409_s27, %s1251_s14 }
  0x23   : > { %p1248_p2 = pnand %p1246_p0, %p1232_p1  ;;  %p1254_p4 = scmp.lt.s32.totalorder %s1252_s19, %s1245_s11 }
  0x25   : > { %p1249_p12 = pneg %p1248_p2  ;;  %p1255_p5 = por %p1254_p4, %p1253_p11 }
  0x27   : > { %p1256_p7 = pnand %p1255_p5, %p1249_p12 }
  0x29   : > { %1259 = shalt.err (!%p1256_p7)
}
  0x2a   : > { %s1329_s20 = smov 512   ;;  %s1330_s21 = smov 32  }
  0x2b   : > { %1187 = dma.hbm_to_vmem [thread:$0]  (!%p1405_p13), %s1403_s24, 19968, %s1409_s27, %s1411_s28, %s1329_s20, %s1329_s20, %s1330_s21  }
  0x2c   : > { %p1167_p9 = scmp.ge.s32.totalorder %s1326_s9, 1  ;;  %p107_p1 = scmp.lt.s32.totalorder %s1326_s9, 3 }
  0x2e   : > { %p108_p3 = pnand %p1167_p9, %p107_p1 }
  0x2f   : > { %s1442_s22 = sand.u32 (!%p108_p3), 1, %s1318_s7  }
  0x30   : > { %111 = sbr.rel (%p108_p3) target bundleno = 261 (0x105), region = 24  ;;  %s114_s26 = scalar_lea.sflag (!%p108_p3), [#allocation3], %s1442_s22 }
  0x31   : > { %s1179_s23 = smul.u32 (!%p108_p3), 1248, %s1442_s22 }
  0x33   : > { %s1448_s29 = scalar_lea.vmem (!%p108_p3), [#allocation2], %s1179_s23 }
  0x37   : > { %1305 = dma.done.wait (%p1383_p6), %s114_s26, 19968  }
  0x38   : > { %1307 = vsyncadd (%p1383_p6), %s114_s26, 4294947328  ;;  %v138_v0 = vld [vmem:[%s1448_s29] sm:$0xff]  ;;  %v139_v1 = vld [vmem:[%s1448_s29 + $0x8] sm:$0xff]  ;;  %s1470_s16 = scalar_lea.vmem [#allocation5], %s1179_s23  ;;  %s1177_s24 = smul.u32 19968, %s1365_s10 }
  0x39   : > { %v140_v2 = vld [vmem:[%s1448_s29 + $0x10] sm:$0xff]  ;;  %v294_v3 = vadd.f32 3.0, %v138_v0  ;;  %v295_v4 = vadd.f32 3.0, %v139_v1  ;;  %v141_v6 = vld [vmem:[%s1448_s29 + $0x18] sm:$0xff]  ;;  %v142_v7 = vld [vmem:[%s1448_s29 + $0x20] sm:$0xff]  ;;  %s1089_s25 = sshll.u32 %s1470_s16, 4  ;;  %s1773_s25 = int_to_ptr.vmem [resolvable:$true] %s1089_s25 }
  0x3a   : > { %v296_v5 = vadd.f32 3.0, %v140_v2  ;;  %v143_v8 = vld [vmem:[%s1448_s29 + $0x28] sm:$0xff]  ;;  %v297_v9 = vadd.f32 3.0, %v141_v6  ;;  %v298_v10 = vadd.f32 3.0, %v142_v7  ;;  %v144_v12 = vld [vmem:[%s1448_s29 + $0x30] sm:$0xff]  ;;  %v145_v13 = vld [vmem:[%s1448_s29 + $0x38] sm:$0xff]  ;;  %s1771_s28 = scalar_lea.hbm %s1822_s1, %s1177_s24 }
  0x3b   : > { %v299_v11 = vadd.f32 3.0, %v143_v8  ;;  %v450_v14 = vmax.f32 %v294_v3, 0.0  ;;  %v451_v15 = vmax.f32 %v295_v4, 0.0  ;;  %v300_v17 = vadd.f32 3.0, %v144_v12  ;;  %v146_v22 = vld [vmem:[%s1448_s29 + $0x40] sm:$0xff]  ;;  %v147_v23 = vld [vmem:[%s1448_s29 + $0x48] sm:$0xff] }
  0x3c   : > { %v452_v16 = vmax.f32 %v296_v5, 0.0  ;;  %v453_v18 = vmax.f32 %v297_v9, 0.0  ;;  %v454_v19 = vmax.f32 %v298_v10, 0.0  ;;  %v301_v21 = vadd.f32 3.0, %v145_v13  ;;  %v148_v28 = vld [vmem:[%s1448_s29 + $0x50] sm:$0xff]  ;;  %v149_v29 = vld [vmem:[%s1448_s29 + $0x58] sm:$0xff] }
  0x3d   : > { %v455_v20 = vmax.f32 %v299_v11, 0.0  ;;  %v606_v24 = vmin.f32 %v450_v14, 6.0  ;;  %v607_v25 = vmin.f32 %v451_v15, 6.0  ;;  %v456_v27 = vmax.f32 %v300_v17, 0.0  ;;  %v150_v34 = vld [vmem:[%s1448_s29 + $0x60] sm:$0xff]  ;;  %v151_v35 = vld [vmem:[%s1448_s29 + $0x68] sm:$0xff] }
  0x3e   : > { %v608_v26 = vmin.f32 %v452_v16, 6.0  ;;  %v609_v30 = vmin.f32 %v453_v18, 6.0  ;;  %v610_v31 = vmin.f32 %v454_v19, 6.0  ;;  %v457_v33 = vmax.f32 %v301_v21, 0.0  ;;  %v152_v50 = vld [vmem:[%s1448_s29 + $0x70] sm:$0xff]  ;;  %v153_v51 = vld [vmem:[%s1448_s29 + $0x78] sm:$0xff] }
  0x3f   : > { %v611_v32 = vmin.f32 %v455_v20, 6.0  ;;  %v762_v36 = vmul.f32 0.16666667, %v606_v24  ;;  %v763_v37 = vmul.f32 0.16666667, %v607_v25  ;;  %v612_v42 = vmin.f32 %v456_v27, 6.0 }
  0x40   : > { %v764_v38 = vmul.f32 0.16666667, %v608_v26  ;;  %v765_v39 = vmul.f32 0.16666667, %v609_v30  ;;  %v766_v40 = vmul.f32 0.16666667, %v610_v31 }
  0x41   : > { %v767_v41 = vmul.f32 0.16666667, %v611_v32  ;;  %918 = vst [vmem:[%s1470_s16] sm:$0xff] %v762_v36  ;;  %919 = vst [vmem:[%s1470_s16 + $0x8] sm:$0xff] %v763_v37  ;;  %v613_v43 = vmin.f32 %v457_v33, 6.0  ;;  %v302_v44 = vadd.f32 3.0, %v146_v22  ;;  %v303_v45 = vadd.f32 3.0, %v147_v23 }
  0x42   : > { %920 = vst [vmem:[%s1470_s16 + $0x10] sm:$0xff] %v764_v38  ;;  %921 = vst [vmem:[%s1470_s16 + $0x18] sm:$0xff] %v765_v39  ;;  %v304_v46 = vadd.f32 3.0, %v148_v28  ;;  %v305_v47 = vadd.f32 3.0, %v149_v29  ;;  %v306_v48 = vadd.f32 3.0, %v150_v34  ;;  %v307_v49 = vadd.f32 3.0, %v151_v35 }
  0x43   : > { %922 = vst [vmem:[%s1470_s16 + $0x20] sm:$0xff] %v766_v40  ;;  %923 = vst [vmem:[%s1470_s16 + $0x28] sm:$0xff] %v767_v41  ;;  %v768_v52 = vmul.f32 0.16666667, %v612_v42  ;;  %v769_v53 = vmul.f32 0.16666667, %v613_v43 }
  0x44   : > { %v458_v54 = vmax.f32 %v302_v44, 0.0  ;;  %v459_v55 = vmax.f32 %v303_v45, 0.0  ;;  %v460_v56 = vmax.f32 %v304_v46, 0.0  ;;  %v461_v57 = vmax.f32 %v305_v47, 0.0  ;;  %v154_v60 = vld [vmem:[%s1448_s29 + $0x80] sm:$0xff]  ;;  %v155_v1 = vld [vmem:[%s1448_s29 + $0x88] sm:$0xff] }
  0x45   : > { %v462_v58 = vmax.f32 %v306_v48, 0.0  ;;  %v463_v59 = vmax.f32 %v307_v49, 0.0  ;;  %924 = vst [vmem:[%s1470_s16 + $0x30] sm:$0xff] %v768_v52  ;;  %925 = vst [vmem:[%s1470_s16 + $0x38] sm:$0xff] %v769_v53  ;;  %v308_v63 = vadd.f32 3.0, %v152_v50  ;;  %v309_v0 = vadd.f32 3.0, %v153_v51 }
  0x46   : > { %v614_v61 = vmin.f32 %v458_v54, 6.0  ;;  %v615_v62 = vmin.f32 %v459_v55, 6.0  ;;  %v156_v2 = vld [vmem:[%s1448_s29 + $0x90] sm:$0xff]  ;;  %v157_v3 = vld [vmem:[%s1448_s29 + $0x98] sm:$0xff]  ;;  %v616_v4 = vmin.f32 %v460_v56, 6.0  ;;  %v617_v5 = vmin.f32 %v461_v57, 6.0 }
  0x47   : > { %v618_v6 = vmin.f32 %v462_v58, 6.0  ;;  %v619_v7 = vmin.f32 %v463_v59, 6.0  ;;  %v158_v8 = vld [vmem:[%s1448_s29 + $0xa0] sm:$0xff]  ;;  %v159_v9 = vld [vmem:[%s1448_s29 + $0xa8] sm:$0xff]  ;;  %v464_v12 = vmax.f32 %v308_v63, 0.0  ;;  %v465_v13 = vmax.f32 %v309_v0, 0.0 }
  0x48   : > { %v770_v10 = vmul.f32 0.16666667, %v614_v61  ;;  %v771_v11 = vmul.f32 0.16666667, %v615_v62  ;;  %v772_v14 = vmul.f32 0.16666667, %v616_v4 }
  0x49   : > { %v773_v15 = vmul.f32 0.16666667, %v617_v5  ;;  %v774_v16 = vmul.f32 0.16666667, %v618_v6  ;;  %v775_v17 = vmul.f32 0.16666667, %v619_v7 }
  0x4a   : > { %926 = vst [vmem:[%s1470_s16 + $0x40] sm:$0xff] %v770_v10  ;;  %927 = vst [vmem:[%s1470_s16 + $0x48] sm:$0xff] %v771_v11  ;;  %v620_v18 = vmin.f32 %v464_v12, 6.0  ;;  %v621_v19 = vmin.f32 %v465_v13, 6.0  ;;  %v310_v20 = vadd.f32 3.0, %v154_v60  ;;  %v311_v21 = vadd.f32 3.0, %v155_v1 }
  0x4b   : > { %928 = vst [vmem:[%s1470_s16 + $0x50] sm:$0xff] %v772_v14  ;;  %929 = vst [vmem:[%s1470_s16 + $0x58] sm:$0xff] %v773_v15  ;;  %v312_v22 = vadd.f32 3.0, %v156_v2  ;;  %v313_v23 = vadd.f32 3.0, %v157_v3  ;;  %v314_v24 = vadd.f32 3.0, %v158_v8  ;;  %v160_v25 = vld [vmem:[%s1448_s29 + $0xb0] sm:$0xff] }
  0x4c   : > { %930 = vst [vmem:[%s1470_s16 + $0x60] sm:$0xff] %v774_v16  ;;  %v161_v26 = vld [vmem:[%s1448_s29 + $0xb8] sm:$0xff]  ;;  %931 = vst [vmem:[%s1470_s16 + $0x68] sm:$0xff] %v775_v17  ;;  %v776_v27 = vmul.f32 0.16666667, %v620_v18  ;;  %v466_v29 = vmax.f32 %v310_v20, 0.0 }
  0x4d   : > { %v777_v28 = vmul.f32 0.16666667, %v621_v19  ;;  %v315_v30 = vadd.f32 3.0, %v159_v9  ;;  %v467_v31 = vmax.f32 %v311_v21, 0.0  ;;  %v468_v32 = vmax.f32 %v312_v22, 0.0  ;;  %v162_v39 = vld [vmem:[%s1448_s29 + $0xc0] sm:$0xff] }
  0x4e   : > { %v469_v33 = vmax.f32 %v313_v23, 0.0  ;;  %v470_v34 = vmax.f32 %v314_v24, 0.0  ;;  %932 = vst [vmem:[%s1470_s16 + $0x70] sm:$0xff] %v776_v27  ;;  %v622_v35 = vmin.f32 %v466_v29, 6.0  ;;  %v316_v37 = vadd.f32 3.0, %v160_v25  ;;  %v163_v40 = vld [vmem:[%s1448_s29 + $0xc8] sm:$0xff] }
  0x4f   : > { %933 = vst [vmem:[%s1470_s16 + $0x78] sm:$0xff] %v777_v28  ;;  %v471_v36 = vmax.f32 %v315_v30, 0.0  ;;  %v317_v38 = vadd.f32 3.0, %v161_v26  ;;  %v164_v41 = vld [vmem:[%s1448_s29 + $0xd0] sm:$0xff]  ;;  %v623_v42 = vmin.f32 %v467_v31, 6.0  ;;  %v624_v43 = vmin.f32 %v468_v32, 6.0 }
  0x50   : > { %v625_v44 = vmin.f32 %v469_v33, 6.0  ;;  %v626_v45 = vmin.f32 %v470_v34, 6.0  ;;  %v165_v46 = vld [vmem:[%s1448_s29 + $0xd8] sm:$0xff]  ;;  %v166_v47 = vld [vmem:[%s1448_s29 + $0xe0] sm:$0xff]  ;;  %v778_v48 = vmul.f32 0.16666667, %v622_v35 }
  0x51   : > { %v627_v49 = vmin.f32 %v471_v36, 6.0  ;;  %v472_v50 = vmax.f32 %v316_v37, 0.0  ;;  %v473_v51 = vmax.f32 %v317_v38, 0.0  ;;  %v167_v52 = vld [vmem:[%s1448_s29 + $0xe8] sm:$0xff]  ;;  %v779_v53 = vmul.f32 0.16666667, %v623_v42 }
  0x52   : > { %v780_v54 = vmul.f32 0.16666667, %v624_v43  ;;  %v781_v55 = vmul.f32 0.16666667, %v625_v44  ;;  %934 = vst [vmem:[%s1470_s16 + $0x80] sm:$0xff] %v778_v48  ;;  %v318_v60 = vadd.f32 3.0, %v162_v39 }
  0x53   : > { %v782_v56 = vmul.f32 0.16666667, %v626_v45  ;;  %v783_v57 = vmul.f32 0.16666667, %v627_v49  ;;  %v628_v58 = vmin.f32 %v472_v50, 6.0  ;;  %v629_v59 = vmin.f32 %v473_v51, 6.0 }
  0x54   : > { %935 = vst [vmem:[%s1470_s16 + $0x88] sm:$0xff] %v779_v53  ;;  %936 = vst [vmem:[%s1470_s16 + $0x90] sm:$0xff] %v780_v54  ;;  %v319_v61 = vadd.f32 3.0, %v163_v40  ;;  %v320_v62 = vadd.f32 3.0, %v164_v41  ;;  %v321_v63 = vadd.f32 3.0, %v165_v46  ;;  %v168_v0 = vld [vmem:[%s1448_s29 + $0xf0] sm:$0xff] }
  0x55   : > { %937 = vst [vmem:[%s1470_s16 + $0x98] sm:$0xff] %v781_v55  ;;  %v169_v1 = vld [vmem:[%s1448_s29 + $0xf8] sm:$0xff]  ;;  %938 = vst [vmem:[%s1470_s16 + $0xa0] sm:$0xff] %v782_v56  ;;  %v784_v2 = vmul.f32 0.16666667, %v628_v58  ;;  %v322_v4 = vadd.f32 3.0, %v166_v47 }
  0x56   : > { %939 = vst [vmem:[%s1470_s16 + $0xa8] sm:$0xff] %v783_v57  ;;  %v785_v3 = vmul.f32 0.16666667, %v629_v59  ;;  %v323_v5 = vadd.f32 3.0, %v167_v52  ;;  %v474_v6 = vmax.f32 %v318_v60, 0.0  ;;  %v475_v7 = vmax.f32 %v319_v61, 0.0 }
  0x57   : > { %v476_v8 = vmax.f32 %v320_v62, 0.0  ;;  %v477_v9 = vmax.f32 %v321_v63, 0.0  ;;  %940 = vst [vmem:[%s1470_s16 + $0xb0] sm:$0xff] %v784_v2  ;;  %v478_v10 = vmax.f32 %v322_v4, 0.0  ;;  %v324_v12 = vadd.f32 3.0, %v168_v0  ;;  %v170_v14 = vld [vmem:[%s1448_s29 + $0x100] sm:$0xff] }
  0x58   : > { %941 = vst [vmem:[%s1470_s16 + $0xb8] sm:$0xff] %v785_v3  ;;  %v479_v11 = vmax.f32 %v323_v5, 0.0  ;;  %v325_v13 = vadd.f32 3.0, %v169_v1  ;;  %v171_v15 = vld [vmem:[%s1448_s29 + $0x108] sm:$0xff]  ;;  %v630_v16 = vmin.f32 %v474_v6, 6.0  ;;  %v631_v17 = vmin.f32 %v475_v7, 6.0 }
  0x59   : > { %v632_v18 = vmin.f32 %v476_v8, 6.0  ;;  %v633_v19 = vmin.f32 %v477_v9, 6.0  ;;  %v172_v20 = vld [vmem:[%s1448_s29 + $0x110] sm:$0xff]  ;;  %v173_v21 = vld [vmem:[%s1448_s29 + $0x118] sm:$0xff]  ;;  %v634_v22 = vmin.f32 %v478_v10, 6.0  ;;  %v480_v24 = vmax.f32 %v324_v12, 0.0 }
  0x5a   : > { %v635_v23 = vmin.f32 %v479_v11, 6.0  ;;  %v481_v25 = vmax.f32 %v325_v13, 0.0  ;;  %v174_v26 = vld [vmem:[%s1448_s29 + $0x120] sm:$0xff]  ;;  %v175_v27 = vld [vmem:[%s1448_s29 + $0x128] sm:$0xff]  ;;  %v786_v28 = vmul.f32 0.16666667, %v630_v16 }
  0x5b   : > { %v787_v29 = vmul.f32 0.16666667, %v631_v17  ;;  %v788_v30 = vmul.f32 0.16666667, %v632_v18  ;;  %v789_v31 = vmul.f32 0.16666667, %v633_v19 }
  0x5c   : > { %v790_v32 = vmul.f32 0.16666667, %v634_v22  ;;  %v791_v33 = vmul.f32 0.16666667, %v635_v23  ;;  %942 = vst [vmem:[%s1470_s16 + $0xc0] sm:$0xff] %v786_v28  ;;  %v636_v34 = vmin.f32 %v480_v24, 6.0 }
  0x5d   : > { %943 = vst [vmem:[%s1470_s16 + $0xc8] sm:$0xff] %v787_v29  ;;  %944 = vst [vmem:[%s1470_s16 + $0xd0] sm:$0xff] %v788_v30  ;;  %v637_v35 = vmin.f32 %v481_v25, 6.0  ;;  %v326_v36 = vadd.f32 3.0, %v170_v14  ;;  %v327_v37 = vadd.f32 3.0, %v171_v15  ;;  %v328_v38 = vadd.f32 3.0, %v172_v20 }
  0x5e   : > { %945 = vst [vmem:[%s1470_s16 + $0xd8] sm:$0xff] %v789_v31  ;;  %946 = vst [vmem:[%s1470_s16 + $0xe0] sm:$0xff] %v790_v32  ;;  %v329_v39 = vadd.f32 3.0, %v173_v21  ;;  %v330_v40 = vadd.f32 3.0, %v174_v26  ;;  %v331_v41 = vadd.f32 3.0, %v175_v27  ;;  %v176_v42 = vld [vmem:[%s1448_s29 + $0x130] sm:$0xff] }
  0x5f   : > { %947 = vst [vmem:[%s1470_s16 + $0xe8] sm:$0xff] %v791_v33  ;;  %v177_v43 = vld [vmem:[%s1448_s29 + $0x138] sm:$0xff]  ;;  %v792_v44 = vmul.f32 0.16666667, %v636_v34  ;;  %v793_v45 = vmul.f32 0.16666667, %v637_v35 }
  0x60   : > { %v482_v46 = vmax.f32 %v326_v36, 0.0  ;;  %v483_v47 = vmax.f32 %v327_v37, 0.0  ;;  %v484_v48 = vmax.f32 %v328_v38, 0.0  ;;  %v485_v49 = vmax.f32 %v329_v39, 0.0  ;;  %v178_v52 = vld [vmem:[%s1448_s29 + $0x140] sm:$0xff]  ;;  %v179_v57 = vld [vmem:[%s1448_s29 + $0x148] sm:$0xff] }
  0x61   : > { %v486_v50 = vmax.f32 %v330_v40, 0.0  ;;  %v487_v51 = vmax.f32 %v331_v41, 0.0  ;;  %948 = vst [vmem:[%s1470_s16 + $0xf0] sm:$0xff] %v792_v44  ;;  %949 = vst [vmem:[%s1470_s16 + $0xf8] sm:$0xff] %v793_v45  ;;  %v332_v55 = vadd.f32 3.0, %v176_v42  ;;  %v333_v56 = vadd.f32 3.0, %v177_v43 }
  0x62   : > { %v638_v53 = vmin.f32 %v482_v46, 6.0  ;;  %v639_v54 = vmin.f32 %v483_v47, 6.0  ;;  %v180_v58 = vld [vmem:[%s1448_s29 + $0x150] sm:$0xff]  ;;  %v181_v59 = vld [vmem:[%s1448_s29 + $0x158] sm:$0xff]  ;;  %v640_v60 = vmin.f32 %v484_v48, 6.0  ;;  %v641_v61 = vmin.f32 %v485_v49, 6.0 }
  0x63   : > { %v642_v62 = vmin.f32 %v486_v50, 6.0  ;;  %v643_v63 = vmin.f32 %v487_v51, 6.0  ;;  %v182_v0 = vld [vmem:[%s1448_s29 + $0x160] sm:$0xff]  ;;  %v183_v1 = vld [vmem:[%s1448_s29 + $0x168] sm:$0xff]  ;;  %v488_v4 = vmax.f32 %v332_v55, 0.0  ;;  %v489_v5 = vmax.f32 %v333_v56, 0.0 }
  0x64   : > { %v794_v2 = vmul.f32 0.16666667, %v638_v53  ;;  %v795_v3 = vmul.f32 0.16666667, %v639_v54  ;;  %v796_v6 = vmul.f32 0.16666667, %v640_v60 }
  0x65   : > { %v797_v7 = vmul.f32 0.16666667, %v641_v61  ;;  %v798_v8 = vmul.f32 0.16666667, %v642_v62  ;;  %v799_v9 = vmul.f32 0.16666667, %v643_v63 }
  0x66   : > { %950 = vst [vmem:[%s1470_s16 + $0x100] sm:$0xff] %v794_v2  ;;  %951 = vst [vmem:[%s1470_s16 + $0x108] sm:$0xff] %v795_v3  ;;  %v644_v10 = vmin.f32 %v488_v4, 6.0  ;;  %v645_v11 = vmin.f32 %v489_v5, 6.0  ;;  %v334_v12 = vadd.f32 3.0, %v178_v52  ;;  %v335_v13 = vadd.f32 3.0, %v179_v57 }
  0x67   : > { %952 = vst [vmem:[%s1470_s16 + $0x110] sm:$0xff] %v796_v6  ;;  %953 = vst [vmem:[%s1470_s16 + $0x118] sm:$0xff] %v797_v7  ;;  %v336_v14 = vadd.f32 3.0, %v180_v58  ;;  %v337_v15 = vadd.f32 3.0, %v181_v59  ;;  %v338_v16 = vadd.f32 3.0, %v182_v0  ;;  %v184_v17 = vld [vmem:[%s1448_s29 + $0x170] sm:$0xff] }
  0x68   : > { %954 = vst [vmem:[%s1470_s16 + $0x120] sm:$0xff] %v798_v8  ;;  %v185_v18 = vld [vmem:[%s1448_s29 + $0x178] sm:$0xff]  ;;  %955 = vst [vmem:[%s1470_s16 + $0x128] sm:$0xff] %v799_v9  ;;  %v800_v19 = vmul.f32 0.16666667, %v644_v10  ;;  %v490_v21 = vmax.f32 %v334_v12, 0.0 }
  0x69   : > { %v801_v20 = vmul.f32 0.16666667, %v645_v11  ;;  %v339_v22 = vadd.f32 3.0, %v183_v1  ;;  %v491_v23 = vmax.f32 %v335_v13, 0.0  ;;  %v492_v24 = vmax.f32 %v336_v14, 0.0  ;;  %v186_v31 = vld [vmem:[%s1448_s29 + $0x180] sm:$0xff] }
  0x6a   : > { %v493_v25 = vmax.f32 %v337_v15, 0.0  ;;  %v494_v26 = vmax.f32 %v338_v16, 0.0  ;;  %956 = vst [vmem:[%s1470_s16 + $0x130] sm:$0xff] %v800_v19  ;;  %v646_v27 = vmin.f32 %v490_v21, 6.0  ;;  %v340_v29 = vadd.f32 3.0, %v184_v17  ;;  %v187_v32 = vld [vmem:[%s1448_s29 + $0x188] sm:$0xff] }
  0x6b   : > { %957 = vst [vmem:[%s1470_s16 + $0x138] sm:$0xff] %v801_v20  ;;  %v495_v28 = vmax.f32 %v339_v22, 0.0  ;;  %v341_v30 = vadd.f32 3.0, %v185_v18  ;;  %v188_v33 = vld [vmem:[%s1448_s29 + $0x190] sm:$0xff]  ;;  %v647_v34 = vmin.f32 %v491_v23, 6.0  ;;  %v648_v35 = vmin.f32 %v492_v24, 6.0 }
  0x6c   : > { %v649_v36 = vmin.f32 %v493_v25, 6.0  ;;  %v650_v37 = vmin.f32 %v494_v26, 6.0  ;;  %v189_v38 = vld [vmem:[%s1448_s29 + $0x198] sm:$0xff]  ;;  %v190_v39 = vld [vmem:[%s1448_s29 + $0x1a0] sm:$0xff]  ;;  %v802_v40 = vmul.f32 0.16666667, %v646_v27 }
  0x6d   : > { %v651_v41 = vmin.f32 %v495_v28, 6.0  ;;  %v496_v42 = vmax.f32 %v340_v29, 0.0  ;;  %v497_v43 = vmax.f32 %v341_v30, 0.0  ;;  %v191_v44 = vld [vmem:[%s1448_s29 + $0x1a8] sm:$0xff]  ;;  %v803_v45 = vmul.f32 0.16666667, %v647_v34 }
  0x6e   : > { %v804_v46 = vmul.f32 0.16666667, %v648_v35  ;;  %v805_v47 = vmul.f32 0.16666667, %v649_v36  ;;  %958 = vst [vmem:[%s1470_s16 + $0x140] sm:$0xff] %v802_v40  ;;  %v342_v52 = vadd.f32 3.0, %v186_v31 }
  0x6f   : > { %v806_v48 = vmul.f32 0.16666667, %v650_v37  ;;  %v807_v49 = vmul.f32 0.16666667, %v651_v41  ;;  %v652_v50 = vmin.f32 %v496_v42, 6.0  ;;  %v653_v51 = vmin.f32 %v497_v43, 6.0 }
  0x70   : > { %959 = vst [vmem:[%s1470_s16 + $0x148] sm:$0xff] %v803_v45  ;;  %960 = vst [vmem:[%s1470_s16 + $0x150] sm:$0xff] %v804_v46  ;;  %v343_v53 = vadd.f32 3.0, %v187_v32  ;;  %v344_v54 = vadd.f32 3.0, %v188_v33  ;;  %v345_v55 = vadd.f32 3.0, %v189_v38  ;;  %v192_v56 = vld [vmem:[%s1448_s29 + $0x1b0] sm:$0xff] }
  0x71   : > { %961 = vst [vmem:[%s1470_s16 + $0x158] sm:$0xff] %v805_v47  ;;  %v193_v57 = vld [vmem:[%s1448_s29 + $0x1b8] sm:$0xff]  ;;  %962 = vst [vmem:[%s1470_s16 + $0x160] sm:$0xff] %v806_v48  ;;  %v808_v58 = vmul.f32 0.16666667, %v652_v50  ;;  %v346_v60 = vadd.f32 3.0, %v190_v39 }
  0x72   : > { %963 = vst [vmem:[%s1470_s16 + $0x168] sm:$0xff] %v807_v49  ;;  %v809_v59 = vmul.f32 0.16666667, %v653_v51  ;;  %v347_v61 = vadd.f32 3.0, %v191_v44  ;;  %v498_v62 = vmax.f32 %v342_v52, 0.0  ;;  %v499_v63 = vmax.f32 %v343_v53, 0.0 }
  0x73   : > { %v500_v0 = vmax.f32 %v344_v54, 0.0  ;;  %v501_v1 = vmax.f32 %v345_v55, 0.0  ;;  %964 = vst [vmem:[%s1470_s16 + $0x170] sm:$0xff] %v808_v58  ;;  %v502_v2 = vmax.f32 %v346_v60, 0.0  ;;  %v348_v4 = vadd.f32 3.0, %v192_v56  ;;  %v194_v6 = vld [vmem:[%s1448_s29 + $0x1c0] sm:$0xff] }
  0x74   : > { %965 = vst [vmem:[%s1470_s16 + $0x178] sm:$0xff] %v809_v59  ;;  %v503_v3 = vmax.f32 %v347_v61, 0.0  ;;  %v349_v5 = vadd.f32 3.0, %v193_v57  ;;  %v195_v7 = vld [vmem:[%s1448_s29 + $0x1c8] sm:$0xff]  ;;  %v654_v8 = vmin.f32 %v498_v62, 6.0  ;;  %v655_v9 = vmin.f32 %v499_v63, 6.0 }
  0x75   : > { %v656_v10 = vmin.f32 %v500_v0, 6.0  ;;  %v657_v11 = vmin.f32 %v501_v1, 6.0  ;;  %v196_v12 = vld [vmem:[%s1448_s29 + $0x1d0] sm:$0xff]  ;;  %v197_v13 = vld [vmem:[%s1448_s29 + $0x1d8] sm:$0xff]  ;;  %v658_v14 = vmin.f32 %v502_v2, 6.0  ;;  %v504_v16 = vmax.f32 %v348_v4, 0.0 }
  0x76   : > { %v659_v15 = vmin.f32 %v503_v3, 6.0  ;;  %v505_v17 = vmax.f32 %v349_v5, 0.0  ;;  %v198_v18 = vld [vmem:[%s1448_s29 + $0x1e0] sm:$0xff]  ;;  %v199_v19 = vld [vmem:[%s1448_s29 + $0x1e8] sm:$0xff]  ;;  %v810_v20 = vmul.f32 0.16666667, %v654_v8 }
  0x77   : > { %v811_v21 = vmul.f32 0.16666667, %v655_v9  ;;  %v812_v22 = vmul.f32 0.16666667, %v656_v10  ;;  %v813_v23 = vmul.f32 0.16666667, %v657_v11 }
  0x78   : > { %v814_v24 = vmul.f32 0.16666667, %v658_v14  ;;  %v815_v25 = vmul.f32 0.16666667, %v659_v15  ;;  %966 = vst [vmem:[%s1470_s16 + $0x180] sm:$0xff] %v810_v20  ;;  %v660_v26 = vmin.f32 %v504_v16, 6.0 }
  0x79   : > { %967 = vst [vmem:[%s1470_s16 + $0x188] sm:$0xff] %v811_v21  ;;  %968 = vst [vmem:[%s1470_s16 + $0x190] sm:$0xff] %v812_v22  ;;  %v661_v27 = vmin.f32 %v505_v17, 6.0  ;;  %v350_v28 = vadd.f32 3.0, %v194_v6  ;;  %v351_v29 = vadd.f32 3.0, %v195_v7  ;;  %v352_v30 = vadd.f32 3.0, %v196_v12 }
  0x7a   : > { %969 = vst [vmem:[%s1470_s16 + $0x198] sm:$0xff] %v813_v23  ;;  %970 = vst [vmem:[%s1470_s16 + $0x1a0] sm:$0xff] %v814_v24  ;;  %v353_v31 = vadd.f32 3.0, %v197_v13  ;;  %v354_v32 = vadd.f32 3.0, %v198_v18  ;;  %v355_v33 = vadd.f32 3.0, %v199_v19  ;;  %v200_v34 = vld [vmem:[%s1448_s29 + $0x1f0] sm:$0xff] }
  0x7b   : > { %971 = vst [vmem:[%s1470_s16 + $0x1a8] sm:$0xff] %v815_v25  ;;  %v201_v35 = vld [vmem:[%s1448_s29 + $0x1f8] sm:$0xff]  ;;  %v816_v36 = vmul.f32 0.16666667, %v660_v26  ;;  %v817_v37 = vmul.f32 0.16666667, %v661_v27 }
  0x7c   : > { %v506_v38 = vmax.f32 %v350_v28, 0.0  ;;  %v507_v39 = vmax.f32 %v351_v29, 0.0  ;;  %v508_v40 = vmax.f32 %v352_v30, 0.0  ;;  %v509_v41 = vmax.f32 %v353_v31, 0.0  ;;  %v202_v44 = vld [vmem:[%s1448_s29 + $0x200] sm:$0xff]  ;;  %v203_v49 = vld [vmem:[%s1448_s29 + $0x208] sm:$0xff] }
  0x7d   : > { %v510_v42 = vmax.f32 %v354_v32, 0.0  ;;  %v511_v43 = vmax.f32 %v355_v33, 0.0  ;;  %972 = vst [vmem:[%s1470_s16 + $0x1b0] sm:$0xff] %v816_v36  ;;  %973 = vst [vmem:[%s1470_s16 + $0x1b8] sm:$0xff] %v817_v37  ;;  %v356_v47 = vadd.f32 3.0, %v200_v34  ;;  %v357_v48 = vadd.f32 3.0, %v201_v35 }
  0x7e   : > { %v662_v45 = vmin.f32 %v506_v38, 6.0  ;;  %v663_v46 = vmin.f32 %v507_v39, 6.0  ;;  %v204_v50 = vld [vmem:[%s1448_s29 + $0x210] sm:$0xff]  ;;  %v205_v51 = vld [vmem:[%s1448_s29 + $0x218] sm:$0xff]  ;;  %v664_v52 = vmin.f32 %v508_v40, 6.0  ;;  %v665_v53 = vmin.f32 %v509_v41, 6.0 }
  0x7f   : > { %v666_v54 = vmin.f32 %v510_v42, 6.0  ;;  %v667_v55 = vmin.f32 %v511_v43, 6.0  ;;  %v206_v56 = vld [vmem:[%s1448_s29 + $0x220] sm:$0xff]  ;;  %v207_v57 = vld [vmem:[%s1448_s29 + $0x228] sm:$0xff]  ;;  %v512_v60 = vmax.f32 %v356_v47, 0.0  ;;  %v513_v61 = vmax.f32 %v357_v48, 0.0 }
  0x80   : > { %v818_v58 = vmul.f32 0.16666667, %v662_v45  ;;  %v819_v59 = vmul.f32 0.16666667, %v663_v46  ;;  %v820_v62 = vmul.f32 0.16666667, %v664_v52 }
  0x81   : > { %v821_v63 = vmul.f32 0.16666667, %v665_v53  ;;  %v822_v0 = vmul.f32 0.16666667, %v666_v54  ;;  %v823_v1 = vmul.f32 0.16666667, %v667_v55 }
  0x82   : > { %974 = vst [vmem:[%s1470_s16 + $0x1c0] sm:$0xff] %v818_v58  ;;  %975 = vst [vmem:[%s1470_s16 + $0x1c8] sm:$0xff] %v819_v59  ;;  %v668_v2 = vmin.f32 %v512_v60, 6.0  ;;  %v669_v3 = vmin.f32 %v513_v61, 6.0  ;;  %v358_v4 = vadd.f32 3.0, %v202_v44  ;;  %v359_v5 = vadd.f32 3.0, %v203_v49 }
  0x83   : > { %976 = vst [vmem:[%s1470_s16 + $0x1d0] sm:$0xff] %v820_v62  ;;  %977 = vst [vmem:[%s1470_s16 + $0x1d8] sm:$0xff] %v821_v63  ;;  %v360_v6 = vadd.f32 3.0, %v204_v50  ;;  %v361_v7 = vadd.f32 3.0, %v205_v51  ;;  %v362_v8 = vadd.f32 3.0, %v206_v56  ;;  %v208_v9 = vld [vmem:[%s1448_s29 + $0x230] sm:$0xff] }
  0x84   : > { %978 = vst [vmem:[%s1470_s16 + $0x1e0] sm:$0xff] %v822_v0  ;;  %v209_v10 = vld [vmem:[%s1448_s29 + $0x238] sm:$0xff]  ;;  %979 = vst [vmem:[%s1470_s16 + $0x1e8] sm:$0xff] %v823_v1  ;;  %v824_v11 = vmul.f32 0.16666667, %v668_v2  ;;  %v514_v13 = vmax.f32 %v358_v4, 0.0 }
  0x85   : > { %v825_v12 = vmul.f32 0.16666667, %v669_v3  ;;  %v363_v14 = vadd.f32 3.0, %v207_v57  ;;  %v515_v15 = vmax.f32 %v359_v5, 0.0  ;;  %v516_v16 = vmax.f32 %v360_v6, 0.0  ;;  %v210_v23 = vld [vmem:[%s1448_s29 + $0x240] sm:$0xff] }
  0x86   : > { %v517_v17 = vmax.f32 %v361_v7, 0.0  ;;  %v518_v18 = vmax.f32 %v362_v8, 0.0  ;;  %980 = vst [vmem:[%s1470_s16 + $0x1f0] sm:$0xff] %v824_v11  ;;  %v670_v19 = vmin.f32 %v514_v13, 6.0  ;;  %v364_v21 = vadd.f32 3.0, %v208_v9  ;;  %v211_v24 = vld [vmem:[%s1448_s29 + $0x248] sm:$0xff] }
  0x87   : > { %981 = vst [vmem:[%s1470_s16 + $0x1f8] sm:$0xff] %v825_v12  ;;  %v519_v20 = vmax.f32 %v363_v14, 0.0  ;;  %v365_v22 = vadd.f32 3.0, %v209_v10  ;;  %v212_v25 = vld [vmem:[%s1448_s29 + $0x250] sm:$0xff]  ;;  %v671_v26 = vmin.f32 %v515_v15, 6.0  ;;  %v672_v27 = vmin.f32 %v516_v16, 6.0 }
  0x88   : > { %v673_v28 = vmin.f32 %v517_v17, 6.0  ;;  %v674_v29 = vmin.f32 %v518_v18, 6.0  ;;  %v213_v30 = vld [vmem:[%s1448_s29 + $0x258] sm:$0xff]  ;;  %v214_v31 = vld [vmem:[%s1448_s29 + $0x260] sm:$0xff]  ;;  %v826_v32 = vmul.f32 0.16666667, %v670_v19 }
  0x89   : > { %v675_v33 = vmin.f32 %v519_v20, 6.0  ;;  %v520_v34 = vmax.f32 %v364_v21, 0.0  ;;  %v521_v35 = vmax.f32 %v365_v22, 0.0  ;;  %v215_v36 = vld [vmem:[%s1448_s29 + $0x268] sm:$0xff]  ;;  %v827_v37 = vmul.f32 0.16666667, %v671_v26 }
  0x8a   : > { %v828_v38 = vmul.f32 0.16666667, %v672_v27  ;;  %v829_v39 = vmul.f32 0.16666667, %v673_v28  ;;  %982 = vst [vmem:[%s1470_s16 + $0x200] sm:$0xff] %v826_v32  ;;  %v366_v44 = vadd.f32 3.0, %v210_v23 }
  0x8b   : > { %v830_v40 = vmul.f32 0.16666667, %v674_v29  ;;  %v831_v41 = vmul.f32 0.16666667, %v675_v33  ;;  %v676_v42 = vmin.f32 %v520_v34, 6.0  ;;  %v677_v43 = vmin.f32 %v521_v35, 6.0 }
  0x8c   : > { %983 = vst [vmem:[%s1470_s16 + $0x208] sm:$0xff] %v827_v37  ;;  %984 = vst [vmem:[%s1470_s16 + $0x210] sm:$0xff] %v828_v38  ;;  %v367_v45 = vadd.f32 3.0, %v211_v24  ;;  %v368_v46 = vadd.f32 3.0, %v212_v25  ;;  %v369_v47 = vadd.f32 3.0, %v213_v30  ;;  %v216_v48 = vld [vmem:[%s1448_s29 + $0x270] sm:$0xff] }
  0x8d   : > { %985 = vst [vmem:[%s1470_s16 + $0x218] sm:$0xff] %v829_v39  ;;  %v217_v49 = vld [vmem:[%s1448_s29 + $0x278] sm:$0xff]  ;;  %986 = vst [vmem:[%s1470_s16 + $0x220] sm:$0xff] %v830_v40  ;;  %v832_v50 = vmul.f32 0.16666667, %v676_v42  ;;  %v370_v52 = vadd.f32 3.0, %v214_v31 }
  0x8e   : > { %987 = vst [vmem:[%s1470_s16 + $0x228] sm:$0xff] %v831_v41  ;;  %v833_v51 = vmul.f32 0.16666667, %v677_v43  ;;  %v371_v53 = vadd.f32 3.0, %v215_v36  ;;  %v522_v54 = vmax.f32 %v366_v44, 0.0  ;;  %v523_v55 = vmax.f32 %v367_v45, 0.0 }
  0x8f   : > { %v524_v56 = vmax.f32 %v368_v46, 0.0  ;;  %v525_v57 = vmax.f32 %v369_v47, 0.0  ;;  %988 = vst [vmem:[%s1470_s16 + $0x230] sm:$0xff] %v832_v50  ;;  %v526_v58 = vmax.f32 %v370_v52, 0.0  ;;  %v372_v60 = vadd.f32 3.0, %v216_v48  ;;  %v218_v62 = vld [vmem:[%s1448_s29 + $0x280] sm:$0xff] }
  0x90   : > { %989 = vst [vmem:[%s1470_s16 + $0x238] sm:$0xff] %v833_v51  ;;  %v527_v59 = vmax.f32 %v371_v53, 0.0  ;;  %v373_v61 = vadd.f32 3.0, %v217_v49  ;;  %v219_v63 = vld [vmem:[%s1448_s29 + $0x288] sm:$0xff]  ;;  %v678_v0 = vmin.f32 %v522_v54, 6.0  ;;  %v679_v1 = vmin.f32 %v523_v55, 6.0 }
  0x91   : > { %v680_v2 = vmin.f32 %v524_v56, 6.0  ;;  %v681_v3 = vmin.f32 %v525_v57, 6.0  ;;  %v220_v4 = vld [vmem:[%s1448_s29 + $0x290] sm:$0xff]  ;;  %v221_v5 = vld [vmem:[%s1448_s29 + $0x298] sm:$0xff]  ;;  %v682_v6 = vmin.f32 %v526_v58, 6.0  ;;  %v528_v8 = vmax.f32 %v372_v60, 0.0 }
  0x92   : > { %v683_v7 = vmin.f32 %v527_v59, 6.0  ;;  %v529_v9 = vmax.f32 %v373_v61, 0.0  ;;  %v222_v10 = vld [vmem:[%s1448_s29 + $0x2a0] sm:$0xff]  ;;  %v223_v11 = vld [vmem:[%s1448_s29 + $0x2a8] sm:$0xff]  ;;  %v834_v12 = vmul.f32 0.16666667, %v678_v0 }
  0x93   : > { %v835_v13 = vmul.f32 0.16666667, %v679_v1  ;;  %v836_v14 = vmul.f32 0.16666667, %v680_v2  ;;  %v837_v15 = vmul.f32 0.16666667, %v681_v3 }
  0x94   : > { %v838_v16 = vmul.f32 0.16666667, %v682_v6  ;;  %v839_v17 = vmul.f32 0.16666667, %v683_v7  ;;  %990 = vst [vmem:[%s1470_s16 + $0x240] sm:$0xff] %v834_v12  ;;  %v684_v18 = vmin.f32 %v528_v8, 6.0 }
  0x95   : > { %991 = vst [vmem:[%s1470_s16 + $0x248] sm:$0xff] %v835_v13  ;;  %992 = vst [vmem:[%s1470_s16 + $0x250] sm:$0xff] %v836_v14  ;;  %v685_v19 = vmin.f32 %v529_v9, 6.0  ;;  %v374_v20 = vadd.f32 3.0, %v218_v62  ;;  %v375_v21 = vadd.f32 3.0, %v219_v63  ;;  %v376_v22 = vadd.f32 3.0, %v220_v4 }
  0x96   : > { %993 = vst [vmem:[%s1470_s16 + $0x258] sm:$0xff] %v837_v15  ;;  %994 = vst [vmem:[%s1470_s16 + $0x260] sm:$0xff] %v838_v16  ;;  %v377_v23 = vadd.f32 3.0, %v221_v5  ;;  %v378_v24 = vadd.f32 3.0, %v222_v10  ;;  %v379_v25 = vadd.f32 3.0, %v223_v11  ;;  %v224_v26 = vld [vmem:[%s1448_s29 + $0x2b0] sm:$0xff] }
  0x97   : > { %995 = vst [vmem:[%s1470_s16 + $0x268] sm:$0xff] %v839_v17  ;;  %v225_v27 = vld [vmem:[%s1448_s29 + $0x2b8] sm:$0xff]  ;;  %v840_v28 = vmul.f32 0.16666667, %v684_v18  ;;  %v841_v29 = vmul.f32 0.16666667, %v685_v19 }
  0x98   : > { %v530_v30 = vmax.f32 %v374_v20, 0.0  ;;  %v531_v31 = vmax.f32 %v375_v21, 0.0  ;;  %v532_v32 = vmax.f32 %v376_v22, 0.0  ;;  %v533_v33 = vmax.f32 %v377_v23, 0.0  ;;  %v226_v36 = vld [vmem:[%s1448_s29 + $0x2c0] sm:$0xff]  ;;  %v227_v41 = vld [vmem:[%s1448_s29 + $0x2c8] sm:$0xff] }
  0x99   : > { %v534_v34 = vmax.f32 %v378_v24, 0.0  ;;  %v535_v35 = vmax.f32 %v379_v25, 0.0  ;;  %996 = vst [vmem:[%s1470_s16 + $0x270] sm:$0xff] %v840_v28  ;;  %997 = vst [vmem:[%s1470_s16 + $0x278] sm:$0xff] %v841_v29  ;;  %v380_v39 = vadd.f32 3.0, %v224_v26  ;;  %v381_v40 = vadd.f32 3.0, %v225_v27 }
  0x9a   : > { %v686_v37 = vmin.f32 %v530_v30, 6.0  ;;  %v687_v38 = vmin.f32 %v531_v31, 6.0  ;;  %v228_v42 = vld [vmem:[%s1448_s29 + $0x2d0] sm:$0xff]  ;;  %v229_v43 = vld [vmem:[%s1448_s29 + $0x2d8] sm:$0xff]  ;;  %v688_v44 = vmin.f32 %v532_v32, 6.0  ;;  %v689_v45 = vmin.f32 %v533_v33, 6.0 }
  0x9b   : > { %v690_v46 = vmin.f32 %v534_v34, 6.0  ;;  %v691_v47 = vmin.f32 %v535_v35, 6.0  ;;  %v230_v48 = vld [vmem:[%s1448_s29 + $0x2e0] sm:$0xff]  ;;  %v231_v49 = vld [vmem:[%s1448_s29 + $0x2e8] sm:$0xff]  ;;  %v536_v52 = vmax.f32 %v380_v39, 0.0  ;;  %v537_v53 = vmax.f32 %v381_v40, 0.0 }
  0x9c   : > { %v842_v50 = vmul.f32 0.16666667, %v686_v37  ;;  %v843_v51 = vmul.f32 0.16666667, %v687_v38  ;;  %v844_v54 = vmul.f32 0.16666667, %v688_v44 }
  0x9d   : > { %v845_v55 = vmul.f32 0.16666667, %v689_v45  ;;  %v846_v56 = vmul.f32 0.16666667, %v690_v46  ;;  %v847_v57 = vmul.f32 0.16666667, %v691_v47 }
  0x9e   : > { %998 = vst [vmem:[%s1470_s16 + $0x280] sm:$0xff] %v842_v50  ;;  %999 = vst [vmem:[%s1470_s16 + $0x288] sm:$0xff] %v843_v51  ;;  %v692_v58 = vmin.f32 %v536_v52, 6.0  ;;  %v693_v59 = vmin.f32 %v537_v53, 6.0  ;;  %v382_v60 = vadd.f32 3.0, %v226_v36  ;;  %v383_v61 = vadd.f32 3.0, %v227_v41 }
  0x9f   : > { %1000 = vst [vmem:[%s1470_s16 + $0x290] sm:$0xff] %v844_v54  ;;  %1001 = vst [vmem:[%s1470_s16 + $0x298] sm:$0xff] %v845_v55  ;;  %v384_v62 = vadd.f32 3.0, %v228_v42  ;;  %v385_v63 = vadd.f32 3.0, %v229_v43  ;;  %v386_v0 = vadd.f32 3.0, %v230_v48  ;;  %v232_v1 = vld [vmem:[%s1448_s29 + $0x2f0] sm:$0xff] }
  0xa0   : > { %1002 = vst [vmem:[%s1470_s16 + $0x2a0] sm:$0xff] %v846_v56  ;;  %v233_v2 = vld [vmem:[%s1448_s29 + $0x2f8] sm:$0xff]  ;;  %1003 = vst [vmem:[%s1470_s16 + $0x2a8] sm:$0xff] %v847_v57  ;;  %v848_v3 = vmul.f32 0.16666667, %v692_v58  ;;  %v538_v5 = vmax.f32 %v382_v60, 0.0 }
  0xa1   : > { %v849_v4 = vmul.f32 0.16666667, %v693_v59  ;;  %v387_v6 = vadd.f32 3.0, %v231_v49  ;;  %v539_v7 = vmax.f32 %v383_v61, 0.0  ;;  %v540_v8 = vmax.f32 %v384_v62, 0.0  ;;  %v234_v15 = vld [vmem:[%s1448_s29 + $0x300] sm:$0xff] }
  0xa2   : > { %v541_v9 = vmax.f32 %v385_v63, 0.0  ;;  %v542_v10 = vmax.f32 %v386_v0, 0.0  ;;  %1004 = vst [vmem:[%s1470_s16 + $0x2b0] sm:$0xff] %v848_v3  ;;  %v694_v11 = vmin.f32 %v538_v5, 6.0  ;;  %v388_v13 = vadd.f32 3.0, %v232_v1  ;;  %v235_v16 = vld [vmem:[%s1448_s29 + $0x308] sm:$0xff] }
  0xa3   : > { %1005 = vst [vmem:[%s1470_s16 + $0x2b8] sm:$0xff] %v849_v4  ;;  %v543_v12 = vmax.f32 %v387_v6, 0.0  ;;  %v389_v14 = vadd.f32 3.0, %v233_v2  ;;  %v236_v17 = vld [vmem:[%s1448_s29 + $0x310] sm:$0xff]  ;;  %v695_v18 = vmin.f32 %v539_v7, 6.0  ;;  %v696_v19 = vmin.f32 %v540_v8, 6.0 }
  0xa4   : > { %v697_v20 = vmin.f32 %v541_v9, 6.0  ;;  %v698_v21 = vmin.f32 %v542_v10, 6.0  ;;  %v237_v22 = vld [vmem:[%s1448_s29 + $0x318] sm:$0xff]  ;;  %v238_v23 = vld [vmem:[%s1448_s29 + $0x320] sm:$0xff]  ;;  %v850_v24 = vmul.f32 0.16666667, %v694_v11 }
  0xa5   : > { %v699_v25 = vmin.f32 %v543_v12, 6.0  ;;  %v544_v26 = vmax.f32 %v388_v13, 0.0  ;;  %v545_v27 = vmax.f32 %v389_v14, 0.0  ;;  %v239_v28 = vld [vmem:[%s1448_s29 + $0x328] sm:$0xff]  ;;  %v851_v29 = vmul.f32 0.16666667, %v695_v18 }
  0xa6   : > { %v852_v30 = vmul.f32 0.16666667, %v696_v19  ;;  %v853_v31 = vmul.f32 0.16666667, %v697_v20  ;;  %1006 = vst [vmem:[%s1470_s16 + $0x2c0] sm:$0xff] %v850_v24  ;;  %v390_v36 = vadd.f32 3.0, %v234_v15 }
  0xa7   : > { %v854_v32 = vmul.f32 0.16666667, %v698_v21  ;;  %v855_v33 = vmul.f32 0.16666667, %v699_v25  ;;  %v700_v34 = vmin.f32 %v544_v26, 6.0  ;;  %v701_v35 = vmin.f32 %v545_v27, 6.0 }
  0xa8   : > { %1007 = vst [vmem:[%s1470_s16 + $0x2c8] sm:$0xff] %v851_v29  ;;  %1008 = vst [vmem:[%s1470_s16 + $0x2d0] sm:$0xff] %v852_v30  ;;  %v391_v37 = vadd.f32 3.0, %v235_v16  ;;  %v392_v38 = vadd.f32 3.0, %v236_v17  ;;  %v393_v39 = vadd.f32 3.0, %v237_v22  ;;  %v240_v40 = vld [vmem:[%s1448_s29 + $0x330] sm:$0xff] }
  0xa9   : > { %1009 = vst [vmem:[%s1470_s16 + $0x2d8] sm:$0xff] %v853_v31  ;;  %v241_v41 = vld [vmem:[%s1448_s29 + $0x338] sm:$0xff]  ;;  %1010 = vst [vmem:[%s1470_s16 + $0x2e0] sm:$0xff] %v854_v32  ;;  %v856_v42 = vmul.f32 0.16666667, %v700_v34  ;;  %v394_v44 = vadd.f32 3.0, %v238_v23 }
  0xaa   : > { %1011 = vst [vmem:[%s1470_s16 + $0x2e8] sm:$0xff] %v855_v33  ;;  %v857_v43 = vmul.f32 0.16666667, %v701_v35  ;;  %v395_v45 = vadd.f32 3.0, %v239_v28  ;;  %v546_v46 = vmax.f32 %v390_v36, 0.0  ;;  %v547_v47 = vmax.f32 %v391_v37, 0.0 }
  0xab   : > { %v548_v48 = vmax.f32 %v392_v38, 0.0  ;;  %v549_v49 = vmax.f32 %v393_v39, 0.0  ;;  %1012 = vst [vmem:[%s1470_s16 + $0x2f0] sm:$0xff] %v856_v42  ;;  %v550_v50 = vmax.f32 %v394_v44, 0.0  ;;  %v396_v52 = vadd.f32 3.0, %v240_v40  ;;  %v242_v54 = vld [vmem:[%s1448_s29 + $0x340] sm:$0xff] }
  0xac   : > { %1013 = vst [vmem:[%s1470_s16 + $0x2f8] sm:$0xff] %v857_v43  ;;  %v551_v51 = vmax.f32 %v395_v45, 0.0  ;;  %v397_v53 = vadd.f32 3.0, %v241_v41  ;;  %v243_v55 = vld [vmem:[%s1448_s29 + $0x348] sm:$0xff]  ;;  %v702_v56 = vmin.f32 %v546_v46, 6.0  ;;  %v703_v57 = vmin.f32 %v547_v47, 6.0 }
  0xad   : > { %v704_v58 = vmin.f32 %v548_v48, 6.0  ;;  %v705_v59 = vmin.f32 %v549_v49, 6.0  ;;  %v244_v60 = vld [vmem:[%s1448_s29 + $0x350] sm:$0xff]  ;;  %v245_v61 = vld [vmem:[%s1448_s29 + $0x358] sm:$0xff]  ;;  %v706_v62 = vmin.f32 %v550_v50, 6.0  ;;  %v552_v0 = vmax.f32 %v396_v52, 0.0 }
  0xae   : > { %v707_v63 = vmin.f32 %v551_v51, 6.0  ;;  %v553_v1 = vmax.f32 %v397_v53, 0.0  ;;  %v246_v2 = vld [vmem:[%s1448_s29 + $0x360] sm:$0xff]  ;;  %v247_v3 = vld [vmem:[%s1448_s29 + $0x368] sm:$0xff]  ;;  %v858_v4 = vmul.f32 0.16666667, %v702_v56 }
  0xaf   : > { %v859_v5 = vmul.f32 0.16666667, %v703_v57  ;;  %v860_v6 = vmul.f32 0.16666667, %v704_v58  ;;  %v861_v7 = vmul.f32 0.16666667, %v705_v59 }
  0xb0   : > { %v862_v8 = vmul.f32 0.16666667, %v706_v62  ;;  %v863_v9 = vmul.f32 0.16666667, %v707_v63  ;;  %1014 = vst [vmem:[%s1470_s16 + $0x300] sm:$0xff] %v858_v4  ;;  %v708_v10 = vmin.f32 %v552_v0, 6.0 }
  0xb1   : > { %1015 = vst [vmem:[%s1470_s16 + $0x308] sm:$0xff] %v859_v5  ;;  %1016 = vst [vmem:[%s1470_s16 + $0x310] sm:$0xff] %v860_v6  ;;  %v709_v11 = vmin.f32 %v553_v1, 6.0  ;;  %v398_v12 = vadd.f32 3.0, %v242_v54  ;;  %v399_v13 = vadd.f32 3.0, %v243_v55  ;;  %v400_v14 = vadd.f32 3.0, %v244_v60 }
  0xb2   : > { %1017 = vst [vmem:[%s1470_s16 + $0x318] sm:$0xff] %v861_v7  ;;  %1018 = vst [vmem:[%s1470_s16 + $0x320] sm:$0xff] %v862_v8  ;;  %v401_v15 = vadd.f32 3.0, %v245_v61  ;;  %v402_v16 = vadd.f32 3.0, %v246_v2  ;;  %v403_v17 = vadd.f32 3.0, %v247_v3  ;;  %v248_v18 = vld [vmem:[%s1448_s29 + $0x370] sm:$0xff] }
  0xb3   : > { %1019 = vst [vmem:[%s1470_s16 + $0x328] sm:$0xff] %v863_v9  ;;  %v249_v19 = vld [vmem:[%s1448_s29 + $0x378] sm:$0xff]  ;;  %v864_v20 = vmul.f32 0.16666667, %v708_v10  ;;  %v865_v21 = vmul.f32 0.16666667, %v709_v11 }
  0xb4   : > { %v554_v22 = vmax.f32 %v398_v12, 0.0  ;;  %v555_v23 = vmax.f32 %v399_v13, 0.0  ;;  %v556_v24 = vmax.f32 %v400_v14, 0.0  ;;  %v557_v25 = vmax.f32 %v401_v15, 0.0  ;;  %v250_v28 = vld [vmem:[%s1448_s29 + $0x380] sm:$0xff]  ;;  %v251_v33 = vld [vmem:[%s1448_s29 + $0x388] sm:$0xff] }
  0xb5   : > { %v558_v26 = vmax.f32 %v402_v16, 0.0  ;;  %v559_v27 = vmax.f32 %v403_v17, 0.0  ;;  %1020 = vst [vmem:[%s1470_s16 + $0x330] sm:$0xff] %v864_v20  ;;  %1021 = vst [vmem:[%s1470_s16 + $0x338] sm:$0xff] %v865_v21  ;;  %v404_v31 = vadd.f32 3.0, %v248_v18  ;;  %v405_v32 = vadd.f32 3.0, %v249_v19 }
  0xb6   : > { %v710_v29 = vmin.f32 %v554_v22, 6.0  ;;  %v711_v30 = vmin.f32 %v555_v23, 6.0  ;;  %v252_v34 = vld [vmem:[%s1448_s29 + $0x390] sm:$0xff]  ;;  %v253_v35 = vld [vmem:[%s1448_s29 + $0x398] sm:$0xff]  ;;  %v712_v36 = vmin.f32 %v556_v24, 6.0  ;;  %v713_v37 = vmin.f32 %v557_v25, 6.0 }
  0xb7   : > { %v714_v38 = vmin.f32 %v558_v26, 6.0  ;;  %v715_v39 = vmin.f32 %v559_v27, 6.0  ;;  %v254_v40 = vld [vmem:[%s1448_s29 + $0x3a0] sm:$0xff]  ;;  %v255_v41 = vld [vmem:[%s1448_s29 + $0x3a8] sm:$0xff]  ;;  %v560_v44 = vmax.f32 %v404_v31, 0.0  ;;  %v561_v45 = vmax.f32 %v405_v32, 0.0 }
  0xb8   : > { %v866_v42 = vmul.f32 0.16666667, %v710_v29  ;;  %v867_v43 = vmul.f32 0.16666667, %v711_v30  ;;  %v868_v46 = vmul.f32 0.16666667, %v712_v36 }
  0xb9   : > { %v869_v47 = vmul.f32 0.16666667, %v713_v37  ;;  %v870_v48 = vmul.f32 0.16666667, %v714_v38  ;;  %v871_v49 = vmul.f32 0.16666667, %v715_v39 }
  0xba   : > { %1022 = vst [vmem:[%s1470_s16 + $0x340] sm:$0xff] %v866_v42  ;;  %1023 = vst [vmem:[%s1470_s16 + $0x348] sm:$0xff] %v867_v43  ;;  %v716_v50 = vmin.f32 %v560_v44, 6.0  ;;  %v717_v51 = vmin.f32 %v561_v45, 6.0  ;;  %v406_v52 = vadd.f32 3.0, %v250_v28  ;;  %v407_v53 = vadd.f32 3.0, %v251_v33 }
  0xbb   : > { %1024 = vst [vmem:[%s1470_s16 + $0x350] sm:$0xff] %v868_v46  ;;  %1025 = vst [vmem:[%s1470_s16 + $0x358] sm:$0xff] %v869_v47  ;;  %v408_v54 = vadd.f32 3.0, %v252_v34  ;;  %v409_v55 = vadd.f32 3.0, %v253_v35  ;;  %v410_v56 = vadd.f32 3.0, %v254_v40  ;;  %v256_v57 = vld [vmem:[%s1448_s29 + $0x3b0] sm:$0xff] }
  0xbc   : > { %1026 = vst [vmem:[%s1470_s16 + $0x360] sm:$0xff] %v870_v48  ;;  %v257_v58 = vld [vmem:[%s1448_s29 + $0x3b8] sm:$0xff]  ;;  %1027 = vst [vmem:[%s1470_s16 + $0x368] sm:$0xff] %v871_v49  ;;  %v872_v59 = vmul.f32 0.16666667, %v716_v50  ;;  %v562_v61 = vmax.f32 %v406_v52, 0.0 }
  0xbd   : > { %v873_v60 = vmul.f32 0.16666667, %v717_v51  ;;  %v411_v62 = vadd.f32 3.0, %v255_v41  ;;  %v563_v63 = vmax.f32 %v407_v53, 0.0  ;;  %v564_v0 = vmax.f32 %v408_v54, 0.0  ;;  %v258_v7 = vld [vmem:[%s1448_s29 + $0x3c0] sm:$0xff] }
  0xbe   : > { %v565_v1 = vmax.f32 %v409_v55, 0.0  ;;  %v566_v2 = vmax.f32 %v410_v56, 0.0  ;;  %1028 = vst [vmem:[%s1470_s16 + $0x370] sm:$0xff] %v872_v59  ;;  %v718_v3 = vmin.f32 %v562_v61, 6.0  ;;  %v412_v5 = vadd.f32 3.0, %v256_v57  ;;  %v259_v8 = vld [vmem:[%s1448_s29 + $0x3c8] sm:$0xff] }
  0xbf   : > { %1029 = vst [vmem:[%s1470_s16 + $0x378] sm:$0xff] %v873_v60  ;;  %v567_v4 = vmax.f32 %v411_v62, 0.0  ;;  %v413_v6 = vadd.f32 3.0, %v257_v58  ;;  %v260_v9 = vld [vmem:[%s1448_s29 + $0x3d0] sm:$0xff]  ;;  %v719_v10 = vmin.f32 %v563_v63, 6.0  ;;  %v720_v11 = vmin.f32 %v564_v0, 6.0 }
  0xc0   : > { %v721_v12 = vmin.f32 %v565_v1, 6.0  ;;  %v722_v13 = vmin.f32 %v566_v2, 6.0  ;;  %v261_v14 = vld [vmem:[%s1448_s29 + $0x3d8] sm:$0xff]  ;;  %v262_v15 = vld [vmem:[%s1448_s29 + $0x3e0] sm:$0xff]  ;;  %v874_v16 = vmul.f32 0.16666667, %v718_v3 }
  0xc1   : > { %v723_v17 = vmin.f32 %v567_v4, 6.0  ;;  %v568_v18 = vmax.f32 %v412_v5, 0.0  ;;  %v569_v19 = vmax.f32 %v413_v6, 0.0  ;;  %v263_v20 = vld [vmem:[%s1448_s29 + $0x3e8] sm:$0xff]  ;;  %v875_v21 = vmul.f32 0.16666667, %v719_v10 }
  0xc2   : > { %v876_v22 = vmul.f32 0.16666667, %v720_v11  ;;  %v877_v23 = vmul.f32 0.16666667, %v721_v12  ;;  %1030 = vst [vmem:[%s1470_s16 + $0x380] sm:$0xff] %v874_v16  ;;  %v414_v28 = vadd.f32 3.0, %v258_v7 }
  0xc3   : > { %v878_v24 = vmul.f32 0.16666667, %v722_v13  ;;  %v879_v25 = vmul.f32 0.16666667, %v723_v17  ;;  %v724_v26 = vmin.f32 %v568_v18, 6.0  ;;  %v725_v27 = vmin.f32 %v569_v19, 6.0 }
  0xc4   : > { %1031 = vst [vmem:[%s1470_s16 + $0x388] sm:$0xff] %v875_v21  ;;  %1032 = vst [vmem:[%s1470_s16 + $0x390] sm:$0xff] %v876_v22  ;;  %v415_v29 = vadd.f32 3.0, %v259_v8  ;;  %v416_v30 = vadd.f32 3.0, %v260_v9  ;;  %v417_v31 = vadd.f32 3.0, %v261_v14  ;;  %v264_v32 = vld [vmem:[%s1448_s29 + $0x3f0] sm:$0xff] }
  0xc5   : > { %1033 = vst [vmem:[%s1470_s16 + $0x398] sm:$0xff] %v877_v23  ;;  %v265_v33 = vld [vmem:[%s1448_s29 + $0x3f8] sm:$0xff]  ;;  %1034 = vst [vmem:[%s1470_s16 + $0x3a0] sm:$0xff] %v878_v24  ;;  %v880_v34 = vmul.f32 0.16666667, %v724_v26  ;;  %v418_v36 = vadd.f32 3.0, %v262_v15 }
  0xc6   : > { %1035 = vst [vmem:[%s1470_s16 + $0x3a8] sm:$0xff] %v879_v25  ;;  %v881_v35 = vmul.f32 0.16666667, %v725_v27  ;;  %v419_v37 = vadd.f32 3.0, %v263_v20  ;;  %v570_v38 = vmax.f32 %v414_v28, 0.0  ;;  %v571_v39 = vmax.f32 %v415_v29, 0.0 }
  0xc7   : > { %v572_v40 = vmax.f32 %v416_v30, 0.0  ;;  %v573_v41 = vmax.f32 %v417_v31, 0.0  ;;  %1036 = vst [vmem:[%s1470_s16 + $0x3b0] sm:$0xff] %v880_v34  ;;  %v574_v42 = vmax.f32 %v418_v36, 0.0  ;;  %v420_v44 = vadd.f32 3.0, %v264_v32  ;;  %v266_v46 = vld [vmem:[%s1448_s29 + $0x400] sm:$0xff] }
  0xc8   : > { %1037 = vst [vmem:[%s1470_s16 + $0x3b8] sm:$0xff] %v881_v35  ;;  %v575_v43 = vmax.f32 %v419_v37, 0.0  ;;  %v421_v45 = vadd.f32 3.0, %v265_v33  ;;  %v267_v47 = vld [vmem:[%s1448_s29 + $0x408] sm:$0xff]  ;;  %v726_v48 = vmin.f32 %v570_v38, 6.0  ;;  %v727_v49 = vmin.f32 %v571_v39, 6.0 }
  0xc9   : > { %v728_v50 = vmin.f32 %v572_v40, 6.0  ;;  %v729_v51 = vmin.f32 %v573_v41, 6.0  ;;  %v268_v52 = vld [vmem:[%s1448_s29 + $0x410] sm:$0xff]  ;;  %v269_v53 = vld [vmem:[%s1448_s29 + $0x418] sm:$0xff]  ;;  %v730_v54 = vmin.f32 %v574_v42, 6.0  ;;  %v576_v56 = vmax.f32 %v420_v44, 0.0 }
  0xca   : > { %v731_v55 = vmin.f32 %v575_v43, 6.0  ;;  %v577_v57 = vmax.f32 %v421_v45, 0.0  ;;  %v270_v58 = vld [vmem:[%s1448_s29 + $0x420] sm:$0xff]  ;;  %v271_v59 = vld [vmem:[%s1448_s29 + $0x428] sm:$0xff]  ;;  %v882_v60 = vmul.f32 0.16666667, %v726_v48 }
  0xcb   : > { %v883_v61 = vmul.f32 0.16666667, %v727_v49  ;;  %v884_v62 = vmul.f32 0.16666667, %v728_v50  ;;  %v885_v63 = vmul.f32 0.16666667, %v729_v51 }
  0xcc   : > { %v886_v0 = vmul.f32 0.16666667, %v730_v54  ;;  %v887_v1 = vmul.f32 0.16666667, %v731_v55  ;;  %1038 = vst [vmem:[%s1470_s16 + $0x3c0] sm:$0xff] %v882_v60  ;;  %v732_v2 = vmin.f32 %v576_v56, 6.0 }
  0xcd   : > { %1039 = vst [vmem:[%s1470_s16 + $0x3c8] sm:$0xff] %v883_v61  ;;  %1040 = vst [vmem:[%s1470_s16 + $0x3d0] sm:$0xff] %v884_v62  ;;  %v733_v3 = vmin.f32 %v577_v57, 6.0  ;;  %v422_v4 = vadd.f32 3.0, %v266_v46  ;;  %v423_v5 = vadd.f32 3.0, %v267_v47  ;;  %v424_v6 = vadd.f32 3.0, %v268_v52 }
  0xce   : > { %1041 = vst [vmem:[%s1470_s16 + $0x3d8] sm:$0xff] %v885_v63  ;;  %1042 = vst [vmem:[%s1470_s16 + $0x3e0] sm:$0xff] %v886_v0  ;;  %v425_v7 = vadd.f32 3.0, %v269_v53  ;;  %v426_v8 = vadd.f32 3.0, %v270_v58  ;;  %v427_v9 = vadd.f32 3.0, %v271_v59  ;;  %v272_v10 = vld [vmem:[%s1448_s29 + $0x430] sm:$0xff] }
  0xcf   : > { %1043 = vst [vmem:[%s1470_s16 + $0x3e8] sm:$0xff] %v887_v1  ;;  %v273_v11 = vld [vmem:[%s1448_s29 + $0x438] sm:$0xff]  ;;  %v888_v12 = vmul.f32 0.16666667, %v732_v2  ;;  %v889_v13 = vmul.f32 0.16666667, %v733_v3 }
  0xd0   : > { %v578_v14 = vmax.f32 %v422_v4, 0.0  ;;  %v579_v15 = vmax.f32 %v423_v5, 0.0  ;;  %v580_v16 = vmax.f32 %v424_v6, 0.0  ;;  %v581_v17 = vmax.f32 %v425_v7, 0.0  ;;  %v274_v20 = vld [vmem:[%s1448_s29 + $0x440] sm:$0xff]  ;;  %v275_v25 = vld [vmem:[%s1448_s29 + $0x448] sm:$0xff] }
  0xd1   : > { %v582_v18 = vmax.f32 %v426_v8, 0.0  ;;  %v583_v19 = vmax.f32 %v427_v9, 0.0  ;;  %1044 = vst [vmem:[%s1470_s16 + $0x3f0] sm:$0xff] %v888_v12  ;;  %1045 = vst [vmem:[%s1470_s16 + $0x3f8] sm:$0xff] %v889_v13  ;;  %v428_v23 = vadd.f32 3.0, %v272_v10  ;;  %v429_v24 = vadd.f32 3.0, %v273_v11 }
  0xd2   : > { %v734_v21 = vmin.f32 %v578_v14, 6.0  ;;  %v735_v22 = vmin.f32 %v579_v15, 6.0  ;;  %v276_v26 = vld [vmem:[%s1448_s29 + $0x450] sm:$0xff]  ;;  %v277_v27 = vld [vmem:[%s1448_s29 + $0x458] sm:$0xff]  ;;  %v736_v28 = vmin.f32 %v580_v16, 6.0  ;;  %v737_v29 = vmin.f32 %v581_v17, 6.0 }
  0xd3   : > { %v738_v30 = vmin.f32 %v582_v18, 6.0  ;;  %v739_v31 = vmin.f32 %v583_v19, 6.0  ;;  %v278_v32 = vld [vmem:[%s1448_s29 + $0x460] sm:$0xff]  ;;  %v279_v33 = vld [vmem:[%s1448_s29 + $0x468] sm:$0xff]  ;;  %v584_v36 = vmax.f32 %v428_v23, 0.0  ;;  %v585_v37 = vmax.f32 %v429_v24, 0.0 }
  0xd4   : > { %v890_v34 = vmul.f32 0.16666667, %v734_v21  ;;  %v891_v35 = vmul.f32 0.16666667, %v735_v22  ;;  %v892_v38 = vmul.f32 0.16666667, %v736_v28 }
  0xd5   : > { %v893_v39 = vmul.f32 0.16666667, %v737_v29  ;;  %v894_v40 = vmul.f32 0.16666667, %v738_v30  ;;  %v895_v41 = vmul.f32 0.16666667, %v739_v31 }
  0xd6   : > { %1046 = vst [vmem:[%s1470_s16 + $0x400] sm:$0xff] %v890_v34  ;;  %1047 = vst [vmem:[%s1470_s16 + $0x408] sm:$0xff] %v891_v35  ;;  %v740_v42 = vmin.f32 %v584_v36, 6.0  ;;  %v741_v43 = vmin.f32 %v585_v37, 6.0  ;;  %v430_v44 = vadd.f32 3.0, %v274_v20  ;;  %v431_v45 = vadd.f32 3.0, %v275_v25 }
  0xd7   : > { %1048 = vst [vmem:[%s1470_s16 + $0x410] sm:$0xff] %v892_v38  ;;  %1049 = vst [vmem:[%s1470_s16 + $0x418] sm:$0xff] %v893_v39  ;;  %v432_v46 = vadd.f32 3.0, %v276_v26  ;;  %v433_v47 = vadd.f32 3.0, %v277_v27  ;;  %v434_v48 = vadd.f32 3.0, %v278_v32  ;;  %v280_v49 = vld [vmem:[%s1448_s29 + $0x470] sm:$0xff] }
  0xd8   : > { %1050 = vst [vmem:[%s1470_s16 + $0x420] sm:$0xff] %v894_v40  ;;  %v281_v50 = vld [vmem:[%s1448_s29 + $0x478] sm:$0xff]  ;;  %1051 = vst [vmem:[%s1470_s16 + $0x428] sm:$0xff] %v895_v41  ;;  %v896_v51 = vmul.f32 0.16666667, %v740_v42  ;;  %v586_v53 = vmax.f32 %v430_v44, 0.0 }
  0xd9   : > { %v897_v52 = vmul.f32 0.16666667, %v741_v43  ;;  %v435_v54 = vadd.f32 3.0, %v279_v33  ;;  %v587_v55 = vmax.f32 %v431_v45, 0.0  ;;  %v588_v56 = vmax.f32 %v432_v46, 0.0  ;;  %v282_v63 = vld [vmem:[%s1448_s29 + $0x480] sm:$0xff] }
  0xda   : > { %v589_v57 = vmax.f32 %v433_v47, 0.0  ;;  %v590_v58 = vmax.f32 %v434_v48, 0.0  ;;  %1052 = vst [vmem:[%s1470_s16 + $0x430] sm:$0xff] %v896_v51  ;;  %v742_v59 = vmin.f32 %v586_v53, 6.0  ;;  %v436_v61 = vadd.f32 3.0, %v280_v49  ;;  %v283_v0 = vld [vmem:[%s1448_s29 + $0x488] sm:$0xff] }
  0xdb   : > { %1053 = vst [vmem:[%s1470_s16 + $0x438] sm:$0xff] %v897_v52  ;;  %v591_v60 = vmax.f32 %v435_v54, 0.0  ;;  %v437_v62 = vadd.f32 3.0, %v281_v50  ;;  %v284_v1 = vld [vmem:[%s1448_s29 + $0x490] sm:$0xff]  ;;  %v743_v2 = vmin.f32 %v587_v55, 6.0  ;;  %v744_v3 = vmin.f32 %v588_v56, 6.0 }
  0xdc   : > { %v745_v4 = vmin.f32 %v589_v57, 6.0  ;;  %v746_v5 = vmin.f32 %v590_v58, 6.0  ;;  %v285_v6 = vld [vmem:[%s1448_s29 + $0x498] sm:$0xff]  ;;  %v286_v7 = vld [vmem:[%s1448_s29 + $0x4a0] sm:$0xff]  ;;  %v898_v8 = vmul.f32 0.16666667, %v742_v59 }
  0xdd   : > { %v747_v9 = vmin.f32 %v591_v60, 6.0  ;;  %v592_v10 = vmax.f32 %v436_v61, 0.0  ;;  %v593_v11 = vmax.f32 %v437_v62, 0.0  ;;  %v287_v12 = vld [vmem:[%s1448_s29 + $0x4a8] sm:$0xff]  ;;  %v899_v13 = vmul.f32 0.16666667, %v743_v2 }
  0xde   : > { %v900_v14 = vmul.f32 0.16666667, %v744_v3  ;;  %v901_v15 = vmul.f32 0.16666667, %v745_v4  ;;  %1054 = vst [vmem:[%s1470_s16 + $0x440] sm:$0xff] %v898_v8  ;;  %v438_v20 = vadd.f32 3.0, %v282_v63 }
  0xdf   : > { %v902_v16 = vmul.f32 0.16666667, %v746_v5  ;;  %v903_v17 = vmul.f32 0.16666667, %v747_v9  ;;  %v748_v18 = vmin.f32 %v592_v10, 6.0  ;;  %v749_v19 = vmin.f32 %v593_v11, 6.0 }
  0xe0   : > { %1055 = vst [vmem:[%s1470_s16 + $0x448] sm:$0xff] %v899_v13  ;;  %1056 = vst [vmem:[%s1470_s16 + $0x450] sm:$0xff] %v900_v14  ;;  %v439_v21 = vadd.f32 3.0, %v283_v0  ;;  %v440_v22 = vadd.f32 3.0, %v284_v1  ;;  %v441_v23 = vadd.f32 3.0, %v285_v6  ;;  %v288_v24 = vld [vmem:[%s1448_s29 + $0x4b0] sm:$0xff] }
  0xe1   : > { %1057 = vst [vmem:[%s1470_s16 + $0x458] sm:$0xff] %v901_v15  ;;  %v289_v25 = vld [vmem:[%s1448_s29 + $0x4b8] sm:$0xff]  ;;  %1058 = vst [vmem:[%s1470_s16 + $0x460] sm:$0xff] %v902_v16  ;;  %v904_v26 = vmul.f32 0.16666667, %v748_v18  ;;  %v442_v28 = vadd.f32 3.0, %v286_v7 }
  0xe2   : > { %1059 = vst [vmem:[%s1470_s16 + $0x468] sm:$0xff] %v903_v17  ;;  %v905_v27 = vmul.f32 0.16666667, %v749_v19  ;;  %v443_v29 = vadd.f32 3.0, %v287_v12  ;;  %v594_v30 = vmax.f32 %v438_v20, 0.0  ;;  %v595_v31 = vmax.f32 %v439_v21, 0.0 }
  0xe3   : > { %v596_v32 = vmax.f32 %v440_v22, 0.0  ;;  %v597_v33 = vmax.f32 %v441_v23, 0.0  ;;  %1060 = vst [vmem:[%s1470_s16 + $0x470] sm:$0xff] %v904_v26  ;;  %v598_v34 = vmax.f32 %v442_v28, 0.0  ;;  %v444_v36 = vadd.f32 3.0, %v288_v24  ;;  %v290_v42 = vld [vmem:[%s1448_s29 + $0x4c0] sm:$0xff] }
  0xe4   : > { %1061 = vst [vmem:[%s1470_s16 + $0x478] sm:$0xff] %v905_v27  ;;  %v599_v35 = vmax.f32 %v443_v29, 0.0  ;;  %v445_v37 = vadd.f32 3.0, %v289_v25  ;;  %v750_v38 = vmin.f32 %v594_v30, 6.0  ;;  %v751_v39 = vmin.f32 %v595_v31, 6.0  ;;  %v291_v43 = vld [vmem:[%s1448_s29 + $0x4c8] sm:$0xff] }
  0xe5   : > { %v752_v40 = vmin.f32 %v596_v32, 6.0  ;;  %v753_v41 = vmin.f32 %v597_v33, 6.0  ;;  %v754_v44 = vmin.f32 %v598_v34, 6.0  ;;  %v600_v46 = vmax.f32 %v444_v36, 0.0  ;;  %v292_v48 = vld [vmem:[%s1448_s29 + $0x4d0] sm:$0xff]  ;;  %v293_v49 = vld [vmem:[%s1448_s29 + $0x4d8] sm:$0xff] }
  0xe6   : > { %v755_v45 = vmin.f32 %v599_v35, 6.0  ;;  %v601_v47 = vmax.f32 %v445_v37, 0.0  ;;  %v906_v50 = vmul.f32 0.16666667, %v750_v38  ;;  %v907_v51 = vmul.f32 0.16666667, %v751_v39 }
  0xe7   : > { %v908_v52 = vmul.f32 0.16666667, %v752_v40  ;;  %v909_v53 = vmul.f32 0.16666667, %v753_v41  ;;  %v910_v54 = vmul.f32 0.16666667, %v754_v44 }
  0xe8   : > { %v911_v55 = vmul.f32 0.16666667, %v755_v45  ;;  %1062 = vst [vmem:[%s1470_s16 + $0x480] sm:$0xff] %v906_v50  ;;  %1063 = vst [vmem:[%s1470_s16 + $0x488] sm:$0xff] %v907_v51  ;;  %v756_v56 = vmin.f32 %v600_v46, 6.0  ;;  %v757_v57 = vmin.f32 %v601_v47, 6.0 }
  0xe9   : > { %1064 = vst [vmem:[%s1470_s16 + $0x490] sm:$0xff] %v908_v52  ;;  %v446_v58 = vadd.f32 3.0, %v290_v42  ;;  %v447_v59 = vadd.f32 3.0, %v291_v43  ;;  %1065 = vst [vmem:[%s1470_s16 + $0x498] sm:$0xff] %v909_v53  ;;  %v448_v60 = vadd.f32 3.0, %v292_v48  ;;  %v449_v61 = vadd.f32 3.0, %v293_v49 }
  0xea   : > { %1066 = vst [vmem:[%s1470_s16 + $0x4a0] sm:$0xff] %v910_v54  ;;  %1067 = vst [vmem:[%s1470_s16 + $0x4a8] sm:$0xff] %v911_v55  ;;  %v912_v62 = vmul.f32 0.16666667, %v756_v56  ;;  %v913_v63 = vmul.f32 0.16666667, %v757_v57 }
  0xeb   : > { %v602_v0 = vmax.f32 %v446_v58, 0.0  ;;  %v603_v1 = vmax.f32 %v447_v59, 0.0  ;;  %v604_v2 = vmax.f32 %v448_v60, 0.0  ;;  %v605_v3 = vmax.f32 %v449_v61, 0.0  ;;  %s1075_s30 = scalar_lea.sflag [#allocation4], %s1442_s22  ;;  %s1260_s2 = scalar_lea.vmem %s1773_s25, 19968 }
  0xec   : > { %1068 = vst [vmem:[%s1470_s16 + $0x4b0] sm:$0xff] %v912_v62  ;;  %1069 = vst [vmem:[%s1470_s16 + $0x4b8] sm:$0xff] %v913_v63  ;;  %p1261_p6 = scmp.ne.s32.totalorder %s1773_s25, %s1260_s2  ;;  %p1828_p11 = scmp.ne.s32.totalorder %s1825_s17, 0 }
  0xed   : > { %v758_v4 = vmin.f32 %v602_v0, 6.0  ;;  %v759_v5 = vmin.f32 %v603_v1, 6.0  ;;  %v760_v6 = vmin.f32 %v604_v2, 6.0  ;;  %v761_v7 = vmin.f32 %v605_v3, 6.0  ;;  %s1331_s3 = smov [#allocation5]  }
  0xee   : > { %p1262_p12 = pnand %p1261_p6, %p1828_p11  ;;  %s1264_s4 = sshll.u32 %s1331_s3, 4  ;;  %s1265_s4 = int_to_ptr.vmem [resolvable:$false] %s1264_s4 }
  0xef   : > { %v914_v8 = vmul.f32 0.16666667, %v758_v4  ;;  %v915_v9 = vmul.f32 0.16666667, %v759_v5  ;;  %v916_v10 = vmul.f32 0.16666667, %v760_v6  ;;  %p1267_p8 = scmp.lt.s32.totalorder %s1773_s25, %s1265_s4 }
  0xf0   : > { %v917_v11 = vmul.f32 0.16666667, %v761_v7  ;;  %p1263_p13 = pneg %p1262_p12  ;;  %s1266_s5 = scalar_lea.vmem %s1265_s4, 39936 }
  0xf1   : > { %1070 = vst [vmem:[%s1470_s16 + $0x4c0] sm:$0xff] %v914_v8  ;;  %1071 = vst [vmem:[%s1470_s16 + $0x4c8] sm:$0xff] %v915_v9  ;;  %p1268_p10 = scmp.lt.s32.totalorder %s1266_s5, %s1260_s2 }
  0xf2   : > { %1072 = vst [vmem:[%s1470_s16 + $0x4d0] sm:$0xff] %v916_v10  ;;  %1073 = vst [vmem:[%s1470_s16 + $0x4d8] sm:$0xff] %v917_v11 }
  0xf3   : > { %p1269_p0 = por %p1268_p10, %p1267_p8 }
  0xf5   : > { %p1270_p2 = pnand %p1269_p0, %p1263_p13 }
  0xf7   : > { %1273 = shalt.err (!%p1270_p2)
}
  0xf8   : > { %s1274_s11 = scalar_lea.hbm %s1771_s28, 19968  ;;  %s1278_s19 = scalar_lea.hbm %s1822_s1, 39936 }
  0xf9   : > { %p1275_p4 = scmp.ne.s32.totalorder %s1771_s28, %s1274_s11  ;;  %p1279_p9 = scmp.lt.u32.totalorder %s1771_s28, %s1822_s1 }
  0xfa   : > { %p1280_p1 = scmp.lt.u32.totalorder %s1278_s19, %s1274_s11  ;;  %p1282_p6 = scmp.lt.u32.totalorder %s1274_s11, %s1771_s28 }
  0xfb   : > { %p1276_p5 = pnand %p1275_p4, %p1828_p11 }
  0xfc   : > { %p1281_p3 = por %p1280_p1, %p1279_p9 }
  0xfd   : > { %p1277_p7 = pneg %p1276_p5 }
  0xfe   : > { %p1283_p12 = por %p1282_p6, %p1281_p3 }
 0x100   : > { %p1284_p13 = pnand %p1283_p12, %p1277_p7 }
 0x102   : > { %1287 = shalt.err (!%p1284_p13)
}
 0x103   : > { %s1332_s23 = smov 512   ;;  %s1333_s26 = smov 32  }
 0x104   : > { %1182 = dma.vmem_to_hbm [thread:$0]  (%p1828_p11), %s1773_s25, 19968, %s1771_s28, %s1075_s30, %s1332_s23, %s1332_s23, %s1333_s26  }
 0x105 PF: > { %s1104_s29 = sand.u32 1, %s1314_s6   ;;  %p1829_p8 = scmp.ne.s32.totalorder %s1826_s18, 0 }
 0x106   : > { %p1830_p10 = scmp.ge.s32.totalorder %s1326_s9, 2  ;;  %s1105_s16 = scalar_lea.sflag [#allocation4], %s1104_s29 }
 0x108   : > { %p1189_p0 = pnand %p1830_p10, %p1829_p8 }
 0x10a   : > { %1309 = dma.done.wait (!%p1189_p0), %s1105_s16, 19968  }
 0x10b   : > { %1311 = vsyncadd (!%p1189_p0), %s1105_s16, 4294947328  ;;  %p14_p2 = scmp.ge.s32.totalorder %s1369_s12, 4   ;;  %s1831_s6 = smov %s1318_s7 }
 0x10c   : > { %s1832_s7 = smov %s1322_s8  ;;  %s1833_s8 = smov %s1381_s15 }
 0x10d   : > { %s1834_s9 = smov %s1369_s12  ;;  %16 = sbr.rel (!%p14_p2) target bundleno = 5 (0x5), region = 69 }
 0x114   :  { %1110 = vsyncpa [#allocation3], 1 }
 0x115   :  { %1112 = vsyncpa [#allocation3 + $0x1], 1 }
 0x116   :  { %1113 = vsyncpa [#allocation4], 1 }
 0x117   :  { %1115 = vsyncpa [#allocation4 + $0x1], 1 }

</bundles_post_ra>
